<compile_context>
chip_gen: v5e
topology: v5e:2x2
jax: 0.10.0
libtpu: 0.0.40
codegen_flags: <defaults>
</compile_context>

<pallas_src>
import jax
import jax.numpy as jnp
from jax.experimental import pallas as pl
from jax.experimental.pallas import tpu as pltpu


def _round_up(x, m):
    return ((x + m - 1) // m) * m


def _self_attention_kernel(x_ref, wqkv_ref, bqkv_ref, gamma_ref, o_ref, qkv_ref):
    # x_ref:    (1, HW, Cp)       bf16 tokens (channel-padded), resident per batch
    # wqkv_ref: (Cp, 2*Ckp + Cp)  bf16 fused, pre-transposed projection weights
    # bqkv_ref: (1, 2*Ckp + Cp)   f32 fused bias
    # gamma_ref:(1,)              f32 scalar in SMEM
    # o_ref:    (1, TQ, Cp)       f32 output tile (lane-dense)
    # qkv_ref:  (HW, 2*Ckp + Cp)  bf16 VMEM cache of the fused projections
    Cp = x_ref.shape[2]
    Ckp = (wqkv_ref.shape[1] - Cp) // 2
    TQ = o_ref.shape[1]
    qi = pl.program_id(1)

    # Fused QKV projection: one lane-dense MXU matmul per batch, cached in VMEM.
    @pl.when(qi == 0)
    def _():
        proj = jnp.dot(x_ref[0], wqkv_ref[...],
                       preferred_element_type=jnp.float32) + bqkv_ref[...]
        qkv_ref[...] = proj.astype(qkv_ref.dtype)

    q0 = pl.multiple_of(qi * TQ, TQ)
    q = qkv_ref[pl.ds(q0, TQ), :Ckp]          # (TQ, Ckp) bf16
    k = qkv_ref[:, Ckp:2 * Ckp]               # (HW, Ckp) bf16
    v = qkv_ref[:, 2 * Ckp:]                  # (HW, Cp)  bf16

    # scores = q @ k^T : contraction over the (padded) Ck axis, trans_b on the MXU.
    s = jax.lax.dot_general(q, k, (((1,), (1,)), ((), ())),
                            preferred_element_type=jnp.float32)        # (TQ, HW) f32

    # Numerically stable softmax over keys (f32 epilogue; EUP reciprocal).
    s = s - jnp.max(s, axis=-1, keepdims=True)
    p = jnp.exp(s)
    p = p * pl.reciprocal(jnp.sum(p, axis=-1, keepdims=True), approx=True)

    # out[i, c] = sum_j attn[i, j] * v[j, c]   (== value @ attn^T in NCHW)
    out = jnp.dot(p.astype(v.dtype), v, preferred_element_type=jnp.float32)  # (TQ, Cp)

    x_q = x_ref[0, pl.ds(q0, TQ), :].astype(jnp.float32)
    o_ref[0] = gamma_ref[0] * out + x_q


def self_attention_forward(x_nchw, params, *, tq=256):
    """x_nchw: (B, C, H, W) float32.  Returns (B, C, H, W) float32."""
    B, C, H, W = x_nchw.shape
    HW = H * W
    Ck = C // 8
    assert Ck >= 1, "channels must be >= 8"

    wq, bq, wk, bk, wv, bv, gamma = params

    # Lane-dense (padded) channel dims.
    Ckp = _round_up(Ck, 128)
    Cp = _round_up(C, 128)
    Wtot = 2 * Ckp + Cp

    # Query tile: largest multiple of 8 that is <= tq and divides HW (else full HW).
    if HW <= tq:
        TQ = HW
    else:
        TQ = (tq // 8) * 8
        while TQ > 8 and HW % TQ != 0:
            TQ -= 8
        if TQ < 8 or HW % TQ != 0:
            TQ = HW

    # Fused, pre-transposed, zero-padded projection weights (kernel does x @ Wqkv).
    wq_t = jnp.zeros((Cp, Ckp), jnp.float32).at[:C, :Ck].set(wq.T)
    wk_t = jnp.zeros((Cp, Ckp), jnp.float32).at[:C, :Ck].set(wk.T)
    wv_t = jnp.zeros((Cp, Cp), jnp.float32).at[:C, :C].set(wv.T)
    wqkv = jnp.concatenate([wq_t, wk_t, wv_t], axis=1).astype(jnp.bfloat16)

    bqkv = jnp.concatenate([
        jnp.zeros((Ckp,), jnp.float32).at[:Ck].set(bq),
        jnp.zeros((Ckp,), jnp.float32).at[:Ck].set(bk),
        jnp.zeros((Cp,), jnp.float32).at[:C].set(bv),
    ]).reshape(1, Wtot)

    # Token-major, channel-padded, bf16 activations.
    x_tok = jnp.transpose(x_nchw.reshape(B, C, HW), (0, 2, 1))           # (B, HW, C)
    x_tok = jnp.pad(x_tok, ((0, 0), (0, 0), (0, Cp - C))).astype(jnp.bfloat16)

    out_tok = pl.pallas_call(
        _self_attention_kernel,
        out_shape=jax.ShapeDtypeStruct((B, HW, Cp), jnp.float32),
        grid_spec=pltpu.PrefetchScalarGridSpec(
            num_scalar_prefetch=0,
            grid=(B, HW // TQ),
            in_specs=[
                pl.BlockSpec((1, HW, Cp), lambda b, qi: (b, 0, 0)),    # x (resident per batch)
                pl.BlockSpec((Cp, Wtot), lambda b, qi: (0, 0)),        # fused W_qkv
                pl.BlockSpec((1, Wtot), lambda b, qi: (0, 0)),         # fused bias
                pl.BlockSpec(memory_space=pltpu.MemorySpace.SMEM),     # gamma scalar
            ],
            out_specs=pl.BlockSpec((1, TQ, Cp), lambda b, qi: (b, qi, 0)),
            scratch_shapes=[pltpu.VMEM((HW, Wtot), jnp.bfloat16)],     # QKV cache
        ),
        compiler_params=pltpu.CompilerParams(
            # qi carries the per-batch QKV cache in scratch -> "arbitrary";
            # batch axis is independent -> "parallel" (megacore sharding).
            dimension_semantics=("parallel", "arbitrary"),
            vmem_limit_bytes=64 * 1024 * 1024,
        ),
    )(x_tok, wqkv, bqkv, gamma.astype(jnp.float32).reshape(1))

    # Drop channel padding and return to NCHW.
    out_tok = out_tok[:, :, :C]
    return jnp.transpose(out_tok, (0, 2, 1)).reshape(B, C, H, W)


def _reference(x_nchw, params):
    """Pure-JAX f32 reference mirroring the PyTorch forward exactly."""
    wq, bq, wk, bk, wv, bv, gamma = params
    B, C, H, W = x_nchw.shape
    HW = H * W
    x_flat = x_nchw.reshape(B, C, HW)                                     # (B, C, HW)
    q = jnp.einsum('oc,bcs->bos', wq, x_flat) + bq[None, :, None]         # (B, Ck, HW)
    k = jnp.einsum('oc,bcs->bos', wk, x_flat) + bk[None, :, None]
    v = jnp.einsum('oc,bcs->bos', wv, x_flat) + bv[None, :, None]         # (B, C, HW)
    q = jnp.transpose(q, (0, 2, 1))                                       # (B, HW, Ck)
    attn = jax.nn.softmax(jnp.einsum('bik,bkj->bij', q, k), axis=-1)      # (B, HW, HW)
    out = jnp.einsum('bcs,bts->bct', v, attn)                             # value @ attn^T
    out = out.reshape(B, C, H, W)
    return gamma[0] * out + x_nchw


if __name__ == "__main__":
    B, C, H, W = 2, 32, 16, 16        # channels must be >= 8 so C//8 >= 1
    Ck = C // 8

    key = jax.random.PRNGKey(0)
    kx, kwq, kbq, kwk, kbk, kwv, kbv = jax.random.split(key, 7)

    x = jax.random.normal(kx, (B, C, H, W), dtype=jnp.float32)

    # Deterministic parameter init (1x1 conv weights squeezed to (out, in)).
    # Note: PyTorch inits gamma to 0; use 0.5 here so the attention path is exercised.
    wq = 0.1 * jax.random.normal(kwq, (Ck, C), dtype=jnp.float32)
    bq = 0.1 * jax.random.normal(kbq, (Ck,), dtype=jnp.float32)
    wk = 0.1 * jax.random.normal(kwk, (Ck, C), dtype=jnp.float32)
    bk = 0.1 * jax.random.normal(kbk, (Ck,), dtype=jnp.float32)
    wv = 0.1 * jax.random.normal(kwv, (C, C), dtype=jnp.float32)
    bv = 0.1 * jax.random.normal(kbv, (C,), dtype=jnp.float32)
    gamma = jnp.array([0.5], dtype=jnp.float32)

    params = (wq, bq, wk, bk, wv, bv, gamma)

    # tq=128 -> HW=256 gives 2 query tiles per batch, exercising the cached-QKV path.
    y = self_attention_forward(x, params, tq=128)
    y = jax.block_until_ready(y)

    y_ref = _reference(x, params)
    assert y.shape == (B, C, H, W)
    # bf16 matmul inputs + approx reciprocal loosen tolerance vs the f32 reference.
    assert jnp.allclose(y, y_ref, atol=3e-2, rtol=3e-2), "mismatch vs JAX reference"

    print("KERNEL_OK")
</pallas_src>

<mosaic_0001>
module attributes {stable_mosaic.version = 11 : i64} {
  func.func @_self_attention_kernel(%arg0: i32, %arg1: i32, %arg2: memref<1x256x128xbf16, #tpu.memory_space<vmem>>, %arg3: memref<128x384xbf16, #tpu.memory_space<vmem>>, %arg4: memref<1x384xf32, #tpu.memory_space<vmem>>, %arg5: memref<1xf32, #tpu.memory_space<smem>>, %arg6: memref<1x128x128xf32, #tpu.memory_space<vmem>>, %arg7: memref<256x384xbf16, #tpu.memory_space<vmem>>) attributes {dimension_semantics = [#tpu.dimension_semantics<parallel>, #tpu.dimension_semantics<arbitrary>], iteration_bounds = array<i64: 2, 2>, scalar_prefetch = 0 : i64, scratch_operands = 1 : i64, tpu.core_type = #tpu.core_type<tc>, window_params = [{transform_indices = @transform_0, window_bounds = array<i64: 1, 256, 128>}, {pipeline_mode = #tpu.pipeline_mode<synchronous>, transform_indices = @transform_1, window_bounds = array<i64: 128, 384>}, {pipeline_mode = #tpu.pipeline_mode<synchronous>, transform_indices = @transform_2, window_bounds = array<i64: 1, 384>}, {transform_indices = @transform_3, window_bounds = array<i64: 1>}, {transform_indices = @transform_4, window_bounds = array<i64: 1, 128, 128>}]} {
    %c0_i32 = arith.constant 0 : i32
    %0 = arith.cmpi eq, %arg1, %c0_i32 : i32
    %1 = arith.extui %0 : i1 to i32
    %c0_i32_0 = arith.constant 0 : i32
    %2 = arith.cmpi ne, %1, %c0_i32_0 : i32
    scf.if %2 {
      %c0_12 = arith.constant 0 : index
      %c0_13 = arith.constant 0 : index
      %c0_14 = arith.constant 0 : index
      %33 = vector.load %arg2[%c0_12, %c0_13, %c0_14] : memref<1x256x128xbf16, #tpu.memory_space<vmem>>, vector<1x256x128xbf16>
      %34 = vector.shape_cast %33 : vector<1x256x128xbf16> to vector<256x128xbf16>
      %c0_15 = arith.constant 0 : index
      %c0_16 = arith.constant 0 : index
      %35 = vector.load %arg3[%c0_15, %c0_16] : memref<128x384xbf16, #tpu.memory_space<vmem>>, vector<128x384xbf16>
      %cst_17 = arith.constant dense<0.000000e+00> : vector<256x384xf32>
      %36 = tpu.matmul %34, %35, %cst_17 {dimension_numbers = #tpu.dot_dimension_numbers<[1], [0], [0], [1], [0, 0, 1, 1], [], []>} : vector<256x128xbf16>, vector<128x384xbf16>, vector<256x384xf32> -> vector<256x384xf32>
      %c0_18 = arith.constant 0 : index
      %c0_19 = arith.constant 0 : index
      %37 = vector.load %arg4[%c0_18, %c0_19] : memref<1x384xf32, #tpu.memory_space<vmem>>, vector<1x384xf32>
      %38 = vector.broadcast %37 : vector<1x384xf32> to vector<256x384xf32>
      %39 = arith.addf %36, %38 : vector<256x384xf32>
      %40 = arith.truncf %39 : vector<256x384xf32> to vector<256x384xbf16>
      %c0_20 = arith.constant 0 : index
      %c0_21 = arith.constant 0 : index
      %41 = vector.load %arg7[%c0_20, %c0_21] : memref<256x384xbf16, #tpu.memory_space<vmem>>, vector<256x384xbf16>
      tpu.vector_store %arg7[%c0_20, %c0_21], %40 {strides = array<i32>} : memref<256x384xbf16, #tpu.memory_space<vmem>>, vector<256x384xbf16>,
    } else {
    }
    %c128_i32 = arith.constant 128 : i32
    %3 = arith.muli %arg1, %c128_i32 : i32
    %4 = tpu.assume_multiple %3, 128 : i32
    %5 = arith.index_cast %4 : i32 to index
    %c0 = arith.constant 0 : index
    %6 = vector.load %arg7[%5, %c0] : memref<256x384xbf16, #tpu.memory_space<vmem>>, vector<128x128xbf16>
    %c0_1 = arith.constant 0 : index
    %c128 = arith.constant 128 : index
    %7 = vector.load %arg7[%c0_1, %c128] : memref<256x384xbf16, #tpu.memory_space<vmem>>, vector<256x128xbf16>
    %c0_2 = arith.constant 0 : index
    %c256 = arith.constant 256 : index
    %8 = vector.load %arg7[%c0_2, %c256] : memref<256x384xbf16, #tpu.memory_space<vmem>>, vector<256x128xbf16>
    %cst = arith.constant dense<0.000000e+00> : vector<128x256xf32>
    %9 = tpu.matmul %6, %7, %cst {dimension_numbers = #tpu.dot_dimension_numbers<[1], [1], [0], [0], [0, 0, 1, 0], [], []>} : vector<128x128xbf16>, vector<256x128xbf16>, vector<128x256xf32> -> vector<128x256xf32>
    %cst_3 = arith.constant dense<0xFF800000> : vector<128xf32>
    %10 = vector.multi_reduction <maximumf>, %9, %cst_3 [1] : vector<128x256xf32> to vector<128xf32>
    %11 = vector.shape_cast %10 : vector<128xf32> to vector<128x1xf32>
    %12 = vector.broadcast %11 : vector<128x1xf32> to vector<128x256xf32>
    %13 = arith.subf %9, %12 : vector<128x256xf32>
    %14 = math.exp %13 : vector<128x256xf32>
    %cst_4 = arith.constant dense<0.000000e+00> : vector<128xf32>
    %15 = vector.multi_reduction <add>, %14, %cst_4 [1] : vector<128x256xf32> to vector<128xf32>
    %16 = vector.shape_cast %15 : vector<128xf32> to vector<128x1xf32>
    %17 = tpu.reciprocal %16 {approx = true} : vector<128x1xf32> -> vector<128x1xf32>
    %18 = vector.broadcast %17 : vector<128x1xf32> to vector<128x256xf32>
    %19 = arith.mulf %14, %18 : vector<128x256xf32>
    %20 = arith.truncf %19 : vector<128x256xf32> to vector<128x256xbf16>
    %cst_5 = arith.constant dense<0.000000e+00> : vector<128x128xf32>
    %21 = tpu.matmul %20, %8, %cst_5 {dimension_numbers = #tpu.dot_dimension_numbers<[1], [0], [0], [1], [0, 0, 1, 1], [], []>} : vector<128x256xbf16>, vector<256x128xbf16>, vector<128x128xf32> -> vector<128x128xf32>
    %c0_6 = arith.constant 0 : index
    %22 = arith.index_cast %4 : i32 to index
    %c0_7 = arith.constant 0 : index
    %23 = vector.load %arg2[%c0_6, %22, %c0_7] : memref<1x256x128xbf16, #tpu.memory_space<vmem>>, vector<1x128x128xbf16>
    %24 = vector.shape_cast %23 : vector<1x128x128xbf16> to vector<128x128xbf16>
    %25 = arith.extf %24 : vector<128x128xbf16> to vector<128x128xf32>
    %c0_8 = arith.constant 0 : index
    %26 = memref.load %arg5[%c0_8] : memref<1xf32, #tpu.memory_space<smem>>
    %27 = vector.broadcast %26 : f32 to vector<128x128xf32>
    %28 = arith.mulf %27, %21 : vector<128x128xf32>
    %29 = arith.addf %28, %25 : vector<128x128xf32>
    %c0_9 = arith.constant 0 : index
    %c0_10 = arith.constant 0 : index
    %c0_11 = arith.constant 0 : index
    %30 = vector.load %arg6[%c0_9, %c0_10, %c0_11] : memref<1x128x128xf32, #tpu.memory_space<vmem>>, vector<1x128x128xf32>
    %31 = vector.shape_cast %30 : vector<1x128x128xf32> to vector<128x128xf32>
    %32 = vector.shape_cast %29 : vector<128x128xf32> to vector<1x128x128xf32>
    tpu.vector_store %arg6[%c0_9, %c0_10, %c0_11], %32 {strides = array<i32>} : memref<1x128x128xf32, #tpu.memory_space<vmem>>, vector<1x128x128xf32>,
    return
  }
  func.func @transform_0(%arg0: i32, %arg1: i32) -> (i32, i32, i32) {
    %c0_i32 = arith.constant 0 : i32
    %c0_i32_0 = arith.constant 0 : i32
    %c0_i32_1 = arith.constant 0 : i32
    return %arg0, %c0_i32, %c0_i32_0 : i32, i32, i32
  }
  func.func @transform_1(%arg0: i32, %arg1: i32) -> (i32, i32) {
    %c0_i32 = arith.constant 0 : i32
    %c0_i32_0 = arith.constant 0 : i32
    %c0_i32_1 = arith.constant 0 : i32
    return %c0_i32, %c0_i32_0 : i32, i32
  }
  func.func @transform_2(%arg0: i32, %arg1: i32) -> (i32, i32) {
    %c0_i32 = arith.constant 0 : i32
    %c0_i32_0 = arith.constant 0 : i32
    %c0_i32_1 = arith.constant 0 : i32
    return %c0_i32, %c0_i32_0 : i32, i32
  }
  func.func @transform_3(%arg0: i32, %arg1: i32) -> i32 {
    %c0_i32 = arith.constant 0 : i32
    %c0_i32_0 = arith.constant 0 : i32
    return %c0_i32 : i32
  }
  func.func @transform_4(%arg0: i32, %arg1: i32) -> (i32, i32, i32) {
    %c0_i32 = arith.constant 0 : i32
    %c0_i32_0 = arith.constant 0 : i32
    return %arg0, %arg1, %c0_i32 : i32, i32, i32
  }
}

</mosaic_0001>

<bundles_post_ra>
// kernel: tpu_custom_call.1
= control target key start
LH: loop header
LB: loop body
LE: loop exit
PB: predicated region body
PF: predicated region fallthrough
CT: control target
= control target key end

     0   :  { %s3558_s0 = inlined_call_operand.hbm [shape: bf16[2,256,128], index: 0, kind: input, shape index: {}]   ;;  %s3559_s1 = inlined_call_operand.hbm [shape: bf16[128,384], index: 1, kind: input, shape index: {}]   ;;  %s3560_s2 = inlined_call_operand.vmem [shape: f32[1,384], index: 2, kind: input, shape index: {}]   ;;  %s3561_s3 = inlined_call_operand.<no memory space> [shape: f32[1], index: 3, kind: input, shape index: {}]   ;;  %s3562_s4 = inlined_call_operand.hbm [shape: f32[2,256,128], index: 4, kind: output, shape index: {}]  }
   0x1   :  { %3571 = sst [smem:[#allocation19_spill]] %s3559_s1 }
   0x2   :  { %3572 = sst [smem:[#allocation20_spill]] %s3562_s4 }
   0x3   :  { %9 = sst [smem:[#allocation3]] %s3561_s3 }
   0x4   :  { %10 = vsyncpa [#allocation5], 0 }
   0x5   :  { %12 = vsyncpa [#allocation5 + $0x1], 0 }
   0x6   :  { %13 = vsyncpa [#allocation8], 0 }
   0x7   :  { %14 = vsyncpa [#allocation6], 0 }
   0x8   :  { %16 = vsyncpa [#allocation6 + $0x1], 0  ;;  %s2852_s17 = smov 0   ;;  %s2854_s18 = smov 0  }
   0x9   :  { %s2856_s19 = smov 0   ;;  %s2858_s20 = smov 0  }
   0xa   :  { %s2860_s21 = smov 0   ;;  %s2862_s22 = smov 0  }
   0xb   :  { %s2864_s23 = smov 0   ;;  %s2866_s3 = smov 0  }
   0xc   :  { %s2868_s24 = smov 0   ;;  %s2870_s25 = smov 0  }
   0xd   :  { %s2872_s26 = smov 0  }
   0xe LB: > { %3573 = sst [smem:[#allocation13_spill]] %s2775_s17  ;;  %s1927_s27 = sadd.s32 4294967295, %s2815_s26   ;;  %s2815_s26 = sphi %s2872_s26, %s22_s26   ;;  %s2811_s25 = sphi %s2870_s25, %s3600_s25   ;;  %s2807_s24 = sphi %s2868_s24, %s3591_s24   ;;  %s2803_s3 = sphi %s2866_s3, %s3599_s3   ;;  %s2799_s23 = sphi %s2864_s23, %s3590_s23   ;;  %s2795_s22 = sphi %s2862_s22, %s3598_s22   ;;  %s2791_s21 = sphi %s2860_s21, %s3597_s21   ;;  %s2787_s20 = sphi %s2858_s20, %s3596_s20   ;;  %s2783_s19 = sphi %s2856_s19, %s3595_s19   ;;  %s2779_s18 = sphi %s2854_s18, %s3594_s18   ;;  %s2775_s17 = sphi %s2852_s17, %s3593_s17  }
   0xf   : > { %3574 = sst [smem:[#allocation14_spill]] %s2807_s24  ;;  %s1928_s28 = sadd.s32 4294967294, %s2815_s26  }
  0x10   : > { %p54_p0 = scmp.ne.s32.totalorder %s2791_s21, %s2787_s20  ;;  %p2908_p1 = scmp.eq.s32.totalorder %s1927_s27, 0 }
  0x11   : > { %p142_p2 = scmp.ne.s32.totalorder %s2783_s19, %s2779_s18  ;;  %p143_p3 = scmp.eq.s32.totalorder %s1927_s27, 3 }
  0x12   : > { %p2916_p4 = por %p2908_p1, %p54_p0  ;;  %p148_p5 = scmp.ne.s32.totalorder %s2779_s18, %s2775_s17 }
  0x13   : > { %p2922_p6 = por %p143_p3, %p142_p2  ;;  %p149_p7 = scmp.eq.s32.totalorder %s1928_s28, 3 }
  0x14   : > { %p1929_p8 = scmp.ge.s32.totalorder %s2815_s26, 1  ;;  %p156_p9 = scmp.lt.s32.totalorder %s2815_s26, 5 }
  0x15   : > { %s3577_s5 = scalar_select %p2922_p6, 1, 0 }
  0x16   : > { %p2928_p10 = por %p149_p7, %p148_p5  ;;  %p2932_p11 = pnand %p1929_p8, %p156_p9 }
  0x17   : > { %3578 = sst [smem:[#allocation15_spill]] %s3577_s5  ;;  %s2817_s11 = smov [#allocation7]  }
  0x18   : > { %s3579_s6 = scalar_select %p2928_p10, 1, 0 }
  0x19   : > { %s3582_s1 = sld [smem:[#allocation19_spill]]  ;;  %p2422_p12 = pneg %p2932_p11 }
  0x1a   : > { %3580 = sst [smem:[#allocation16_spill]] %s3579_s6  ;;  %s169_s12 = sshll.u32 %s2817_s11, 4  ;;  %s170_s12 = int_to_ptr.vmem [resolvable:$true] %s169_s12 }
  0x1b   : > { %p2423_p13 = pnand %p2422_p12, %p2908_p1  ;;  %s2818_s13 = smov 192  }
  0x1c   : > { %s2819_s14 = smov 12   ;;  %s31_s15 = sadd.s32 1, %s2807_s24 }
  0x1d   : > { %s34_s16 = sadd.s32 1, %s2811_s25  ;;  %p32_p0 = scmp.ge.s32.totalorder %s31_s15, 2 }
  0x1e   : > { %s41_s20 = sadd.s32 1, %s2795_s22  ;;  %p48_p2 = scmp.ne.s32.totalorder %s2795_s22, %s2791_s21 }
  0x1f   : > { %s167_s10 = sshll.u32 %s3582_s1, 4  ;;  %p49_p3 = scmp.eq.s32.totalorder %s2815_s26, 0  ;;  %s168_s10 = int_to_ptr.hbm [resolvable:$true] %s167_s10 }
  0x20   : > { %2425 = dma.hbm_to_vmem [thread:$0]  (!%p2423_p13), %s168_s10, 3072, %s170_s12, [#allocation8], %s2818_s13, %s2818_s13, %s2819_s14  }
  0x21   : > { %s3602_s15 = smov (%p32_p0, %s31_s15), 0  ;;  %s3604_s16 = smov (!%p32_p0, %s34_s16), %s2811_s25 }
  0x22   : > { %3583 = sst [smem:[#allocation17_spill]] %s3602_s15  ;;  %p2952_p5 = por %p49_p3, %p48_p2 }
  0x23   : > { %s128_s28 = ssub.s32 %s2807_s24, %s3602_s15  ;;  %p36_p7 = scmp.ge.s32.totalorder %s3604_s16, 2 }
  0x24   : > { %s132_s8 = sadd.s32 1, %s2783_s19  ;;  %p2435_p8 = scmp.lt.s32.totalorder %s2815_s26, 4 }
  0x25   : > { %s189_s9 = sand.u32 1, %s2795_s22   ;;  %s3606_s16 = smov (%p36_p7, %s3604_s16), 0 }
  0x26   : > { %3585 = sst [smem:[#allocation18_spill]] %s3606_s16  ;;  %s1932_s10 = sshll.u32 %s189_s9, 7 }
  0x27   : > { %s38_s11 = ssub.s32 %s2811_s25, %s3606_s16  ;;  %s2269_s13 = sshll.u32 %s2811_s25, 7 }
  0x28   : > { %p39_p9 = scmp.eq.s32.totalorder %s38_s11, 0  ;;  %s129_s12 = sor.u32 %s128_s28, %s38_s11 }
  0x29   : > { %p130_p12 = scmp.eq.s32.totalorder %s129_s12, 0  ;;  %s198_s6 = scalar_lea.hbm %s3558_s0, %s2269_s13 }
  0x2a   : > { %s2967_s14 = scalar_select %p39_p9, %s2795_s22, %s41_s20  }
  0x2b   : > { %s2970_s1 = scalar_select %p130_p12, %s2783_s19, %s132_s8  }
  0x2c   : > { %s193_s17 = scalar_lea.vmem [#allocation4], %s1932_s10  ;;  %s199_s4 = sshll.u32 %s198_s6, 4  ;;  %s200_s4 = int_to_ptr.hbm [resolvable:$true] %s199_s4 }
  0x2d   : > { %s201_s5 = sshll.u32 %s193_s17, 4  ;;  %p2427_p13 = pnand %p2435_p8, %p2952_p5  ;;  %s202_s5 = int_to_ptr.vmem [resolvable:$true] %s201_s5 }
  0x2e   : > { %s190_s16 = scalar_lea.sflag [#allocation5], %s189_s9  ;;  %s2820_s28 = smov 64  }
  0x2f   : > { %s2821_s11 = smov 4   ;;  %213 = sbr.rel (%p2932_p11) target bundleno = 1207 (0x4b7), region = 36 }
  0x30   : > { %2429 = dma.hbm_to_vmem [thread:$0]  (!%p2427_p13), %s200_s4, 2048, %s202_s5, %s190_s16, %s2820_s28, %s2820_s28, %s2821_s11  }
  0x31   : > { %s215_s20 = sand.u32 (!%p2932_p11), 1, %s2791_s21  }
  0x32   : > { %s1936_s24 = sshll.u32 (!%p2932_p11), %s215_s20, 7  ;;  %s216_s15 = scalar_lea.sflag (!%p2932_p11), [#allocation5], %s215_s20 }
  0x33   : > { %s2982_s8 = scalar_lea.vmem (!%p2932_p11), [#allocation4], %s1936_s24 }
  0x34   : > { %2762 = dma.done.wait (%p2916_p4), %s216_s15, 2048  }
  0x35   : > { %2764 = vsyncadd (%p2916_p4), %s216_s15, 4294965248 }
  0x36   : > { %2766 = dma.done.wait (%p2908_p1), [#allocation8], 3072  }
  0x37   : > { %2768 = vsyncadd (%p2908_p1), [#allocation8], 4294964224  ;;  %s247_s4 = sand.u32 1, %s2779_s18   ;;  %p1939_p11 = scmp.ne.s32.totalorder %s2799_s23, 0 }
  0x38   : > { %s1938_s17 = sshll.u32 %s247_s4, 7 }
  0x39   : > { %s2995_s5 = scalar_lea.vmem [#allocation9], %s1938_s17  ;;  %254 = sbr.rel (%p1939_p11) target bundleno = 419 (0x1a3), region = 48 }
  0x3e   : > { %v2090_v0 = vld [vmem:[#allocation7 + $0xa8] sm:$0xf]  ;;  %v2308_v1 = vld [vmem:[#allocation7 + $0xb0] sm:$0xf0]  ;;  %v2307_v2 = vld [vmem:[#allocation7 + $0xac] sm:$0xf] }
  0x3f   : > { %v2091_v3 = vor.u32 %v2308_v1, %v2090_v0  ;;  %v2092_v4 = vld [vmem:[#allocation7 + $0xb4] sm:$0xf0]  ;;  %v2098_v5 = vld [vmem:[#allocation7 + $0xb0] sm:$0xf]  ;;  %v2309_v6 = vld [vmem:[#allocation7 + $0xb8] sm:$0xf0] }
  0x40   : > { %v2998_v7 = vor.u32 %v2307_v2, %v2092_v4  ;;  %v3000_v8 = vor.u32 %v2309_v6, %v2098_v5  ;;  %v2078_v9 = vld [vmem:[#allocation7 + $0x90] sm:$0xf]  ;;  %v2305_v10 = vld [vmem:[#allocation7 + $0x98] sm:$0xf0]  ;;  %v2304_v11 = vld [vmem:[#allocation7 + $0x94] sm:$0xf] }
  0x41   : > { %551 = vmatpush.bf16.msra.mxu0 %v2091_v3  ;;  %2390 = vmatpush.bf16.msra.mxu3 %v2091_v3  ;;  %v2079_v12 = vor.u32 %v2305_v10, %v2078_v9  ;;  %v2080_v13 = vld [vmem:[#allocation7 + $0x9c] sm:$0xf0]  ;;  %v2086_v14 = vld [vmem:[#allocation7 + $0x98] sm:$0xf]  ;;  %v2306_v15 = vld [vmem:[#allocation7 + $0xa0] sm:$0xf0] }
  0x42   : > { %640 = vmatpush.bf16.msra.mxu1 %v2998_v7  ;;  %729 = vmatpush.bf16.msra.mxu2 %v3000_v8  ;;  %v3004_v16 = vor.u32 %v2304_v11, %v2080_v13  ;;  %v3006_v17 = vor.u32 %v2306_v15, %v2086_v14  ;;  %v2066_v18 = vld [vmem:[#allocation7 + $0x78] sm:$0xf]  ;;  %v2302_v19 = vld [vmem:[#allocation7 + $0x80] sm:$0xf0]  ;;  %v2301_v20 = vld [vmem:[#allocation7 + $0x7c] sm:$0xf] }
  0x43   : > { %v2068_v21 = vld [vmem:[#allocation7 + $0x84] sm:$0xf0]  ;;  %v2074_v22 = vld [vmem:[#allocation7 + $0x80] sm:$0xf]  ;;  %v2303_v23 = vld [vmem:[#allocation7 + $0x88] sm:$0xf0]  ;;  %v2067_v24 = vor.u32 %v2302_v19, %v2066_v18 }
  0x44   : > { %v3010_v25 = vor.u32 %v2301_v20, %v2068_v21  ;;  %v3012_v26 = vor.u32 %v2303_v23, %v2074_v22  ;;  %v2054_v27 = vld [vmem:[#allocation7 + $0x60] sm:$0xf]  ;;  %v2299_v28 = vld [vmem:[#allocation7 + $0x68] sm:$0xf0]  ;;  %v2298_v29 = vld [vmem:[#allocation7 + $0x64] sm:$0xf] }
  0x45   : > { %552 = vmatpush.bf16.msra.mxu0 %v2079_v12  ;;  %2391 = vmatpush.bf16.msra.mxu3 %v2079_v12  ;;  %v2056_v30 = vld [vmem:[#allocation7 + $0x6c] sm:$0xf0]  ;;  %v2062_v31 = vld [vmem:[#allocation7 + $0x68] sm:$0xf]  ;;  %v2300_v32 = vld [vmem:[#allocation7 + $0x70] sm:$0xf0]  ;;  %v2055_v33 = vor.u32 %v2299_v28, %v2054_v27 }
  0x46   : > { %641 = vmatpush.bf16.msra.mxu1 %v3004_v16  ;;  %730 = vmatpush.bf16.msra.mxu2 %v3006_v17  ;;  %v3016_v34 = vor.u32 %v2298_v29, %v2056_v30  ;;  %v3018_v35 = vor.u32 %v2300_v32, %v2062_v31  ;;  %v2042_v36 = vld [vmem:[#allocation7 + $0x48] sm:$0xf]  ;;  %v2296_v37 = vld [vmem:[#allocation7 + $0x50] sm:$0xf0]  ;;  %v2295_v38 = vld [vmem:[#allocation7 + $0x4c] sm:$0xf] }
  0x47   : > { %v2044_v39 = vld [vmem:[#allocation7 + $0x54] sm:$0xf0]  ;;  %v2050_v40 = vld [vmem:[#allocation7 + $0x50] sm:$0xf]  ;;  %v2297_v41 = vld [vmem:[#allocation7 + $0x58] sm:$0xf0]  ;;  %v2043_v42 = vor.u32 %v2296_v37, %v2042_v36 }
  0x48   : > { %v2047_v43 = vor.u32 %v2295_v38, %v2044_v39  ;;  %v3022_v44 = vor.u32 %v2297_v41, %v2050_v40  ;;  %v2030_v45 = vld [vmem:[#allocation7 + $0x30] sm:$0xf]  ;;  %v2293_v46 = vld [vmem:[#allocation7 + $0x38] sm:$0xf0]  ;;  %v2292_v47 = vld [vmem:[#allocation7 + $0x34] sm:$0xf] }
  0x49   : > { %553 = vmatpush.bf16.msra.mxu0 %v2067_v24  ;;  %2392 = vmatpush.bf16.msra.mxu3 %v2067_v24  ;;  %v2032_v48 = vld [vmem:[#allocation7 + $0x3c] sm:$0xf0]  ;;  %v2038_v49 = vld [vmem:[#allocation7 + $0x38] sm:$0xf]  ;;  %v2294_v50 = vld [vmem:[#allocation7 + $0x40] sm:$0xf0]  ;;  %v2031_v51 = vor.u32 %v2293_v46, %v2030_v45 }
  0x4a   : > { %642 = vmatpush.bf16.msra.mxu1 %v3010_v25  ;;  %731 = vmatpush.bf16.msra.mxu2 %v3012_v26  ;;  %v2035_v52 = vor.u32 %v2292_v47, %v2032_v48  ;;  %v3025_v53 = vor.u32 %v2294_v50, %v2038_v49  ;;  %v2018_v54 = vld [vmem:[#allocation7 + $0x18] sm:$0xf]  ;;  %v2290_v55 = vld [vmem:[#allocation7 + $0x20] sm:$0xf0]  ;;  %v2289_v56 = vld [vmem:[#allocation7 + $0x1c] sm:$0xf] }
  0x4b   : > { %v2020_v57 = vld [vmem:[#allocation7 + $0x24] sm:$0xf0]  ;;  %v2026_v58 = vld [vmem:[#allocation7 + $0x20] sm:$0xf]  ;;  %v2291_v59 = vld [vmem:[#allocation7 + $0x28] sm:$0xf0]  ;;  %v2019_v60 = vor.u32 %v2290_v55, %v2018_v54 }
  0x4c   : > { %v2023_v61 = vor.u32 %v2289_v56, %v2020_v57  ;;  %v2027_v62 = vor.u32 %v2291_v59, %v2026_v58  ;;  %v2006_v63 = vld [vmem:[#allocation7] sm:$0xf]  ;;  %v2287_v0 = vld [vmem:[#allocation7 + $0x8] sm:$0xf0]  ;;  %v2286_v1 = vld [vmem:[#allocation7 + $0x4] sm:$0xf] }
  0x4d   : > { %554 = vmatpush.bf16.msra.mxu0 %v2055_v33  ;;  %2393 = vmatpush.bf16.msra.mxu3 %v2055_v33  ;;  %v2008_v2 = vld [vmem:[#allocation7 + $0xc] sm:$0xf0]  ;;  %v2014_v3 = vld [vmem:[#allocation7 + $0x8] sm:$0xf]  ;;  %v2288_v4 = vld [vmem:[#allocation7 + $0x10] sm:$0xf0]  ;;  %v2007_v5 = vor.u32 %v2287_v0, %v2006_v63 }
  0x4e   : > { %643 = vmatpush.bf16.msra.mxu1 %v3016_v34  ;;  %732 = vmatpush.bf16.msra.mxu2 %v3018_v35  ;;  %v2011_v6 = vor.u32 %v2286_v1, %v2008_v2  ;;  %v2015_v9 = vor.u32 %v2288_v4, %v2014_v3  ;;  %v2270_v10 = vld [vmem:[%s2982_s8] sm:$0xff]  ;;  %v2271_v12 = vld [vmem:[%s2982_s8 + $0x8] sm:$0xff]  ;;  %v3044_v14 = vld [vmem:[%s2982_s8 + $0x70] sm:$0xff] }
  0x4f   : > { %v3030_v11 = vld [vmem:[%s2982_s8 + $0x60] sm:$0xff]  ;;  %v3039_v13 = vld [vmem:[%s2982_s8 + $0x68] sm:$0xff]  ;;  %v2273_v15 = vld [vmem:[%s2982_s8 + $0x18] sm:$0xff] }
  0x50   : > { %v2276_v18 = vld [vmem:[%s2982_s8 + $0x30] sm:$0xff]  ;;  %v2277_v19 = vld [vmem:[%s2982_s8 + $0x38] sm:$0xff]  ;;  %v319_v20 = vld [vmem:[%s3560_s2] sm:$0x7] }
  0x51   : > { %555 = vmatpush.bf16.msra.mxu0 %v2043_v42  ;;  %2394 = vmatpush.bf16.msra.mxu3 %v2043_v42  ;;  %v3069_v21 = vperm.slane %v319_v20, 0  ;;  %v3071_v22 = vperm.slane %v319_v20, 1  ;;  %v2278_v23 = vld [vmem:[%s2982_s8 + $0x40] sm:$0xff]  ;;  %v3077_v29 = vperm.slane %v319_v20, 2  ;;  %v2279_v41 = vld [vmem:[%s2982_s8 + $0x48] sm:$0xff] }
  0x52   : > { %644 = vmatpush.bf16.msra.mxu1 %v2047_v43  ;;  %733 = vmatpush.bf16.msra.mxu2 %v3022_v44 }
  0x55   : > { %556 = vmatpush.bf16.msra.mxu0 %v2031_v51  ;;  %2395 = vmatpush.bf16.msra.mxu3 %v2031_v51 }
  0x56   : > { %645 = vmatpush.bf16.msra.mxu1 %v2035_v52  ;;  %734 = vmatpush.bf16.msra.mxu2 %v3025_v53 }
  0x59   : > { %557 = vmatpush.bf16.msra.mxu0 %v2019_v60  ;;  %2396 = vmatpush.bf16.msra.mxu3 %v2019_v60  ;;  %v2280_v60 = vld [vmem:[%s2982_s8 + $0x50] sm:$0xff] }
  0x5a   : > { %646 = vmatpush.bf16.msra.mxu1 %v2023_v61  ;;  %735 = vmatpush.bf16.msra.mxu2 %v2027_v62 }
  0x5d   : > { %558 = vmatpush.bf16.msra.mxu0 %v2007_v5  ;;  %2397 = vmatpush.bf16.msra.mxu3 %v2007_v5 }
  0x5e   : > { %647 = vmatpush.bf16.msra.mxu1 %v2011_v6  ;;  %736 = vmatpush.bf16.msra.mxu2 %v2015_v9 }
  0x60   : > { %559 = vmatmul.bf16.vlgmr.msra.gmra.mxu0 %v2270_v10  ;;  %619 = vmatmul.bf16.vlgmr.msra.gmra.mxu3 %v3030_v11 }
  0x61   : > { %2398 = vmatpush.bf16.msrb.mxu3 %v2998_v7  ;;  %648 = vmatmul.bf16.vlgmr.msra.gmra.mxu1 %v2270_v10  ;;  %v2272_v7 = vld [vmem:[%s2982_s8 + $0x10] sm:$0xff] }
  0x62   : > { %737 = vmatmul.bf16.vlgmr.msra.gmra.mxu2 %v2270_v10 }
  0x65   : > { %2399 = vmatpush.bf16.msrb.mxu3 %v3004_v16  ;;  %v3053_v16 = vld [vmem:[%s2982_s8 + $0x78] sm:$0xff] }
  0x69   : > { %2400 = vmatpush.bf16.msrb.mxu3 %v3010_v25 }
  0x6d   : > { %2401 = vmatpush.bf16.msrb.mxu3 %v3016_v34 }
  0x70   : > { %564 = vmatmul.bf16.gmra.mxu0 %v2271_v12  ;;  %624 = vmatmul.bf16.gmra.mxu3 %v3039_v13 }
  0x71   : > { %2402 = vmatpush.bf16.msrb.mxu3 %v2047_v43  ;;  %653 = vmatmul.bf16.gmra.mxu1 %v2271_v12 }
  0x72   : > { %742 = vmatmul.bf16.gmra.mxu2 %v2271_v12 }
  0x75   : > { %2403 = vmatpush.bf16.msrb.mxu3 %v2035_v52 }
  0x79   : > { %2404 = vmatpush.bf16.msrb.mxu3 %v2023_v61 }
  0x7d   : > { %2405 = vmatpush.bf16.msrb.mxu3 %v2011_v6 }
  0x80   : > { %569 = vmatmul.bf16.gmra.mxu0 %v2272_v7  ;;  %629 = vmatmul.bf16.gmra.mxu3 %v3044_v14 }
  0x81   : > { %2406 = vmatpush.bf16.msra.mxu3 %v3000_v8  ;;  %658 = vmatmul.bf16.gmra.mxu1 %v2272_v7  ;;  %v2274_v8 = vld [vmem:[%s2982_s8 + $0x20] sm:$0xff] }
  0x82   : > { %747 = vmatmul.bf16.gmra.mxu2 %v2272_v7 }
  0x85   : > { %2407 = vmatpush.bf16.msra.mxu3 %v3006_v17  ;;  %v2275_v17 = vld [vmem:[%s2982_s8 + $0x28] sm:$0xff] }
  0x89   : > { %2408 = vmatpush.bf16.msra.mxu3 %v3012_v26 }
  0x8d   : > { %2409 = vmatpush.bf16.msra.mxu3 %v3018_v35 }
  0x90   : > { %574 = vmatmul.bf16.gmra.mxu0 %v2273_v15  ;;  %634 = vmatmul.bf16.gmra.mxu3 %v3053_v16 }
  0x91   : > { %2410 = vmatpush.bf16.msra.mxu3 %v3022_v44  ;;  %663 = vmatmul.bf16.gmra.mxu1 %v2273_v15 }
  0x92   : > { %752 = vmatmul.bf16.gmra.mxu2 %v2273_v15 }
  0x95   : > { %2411 = vmatpush.bf16.msra.mxu3 %v3025_v53 }
  0x99   : > { %2412 = vmatpush.bf16.msra.mxu3 %v2027_v62 }
  0x9d   : > { %2413 = vmatpush.bf16.msra.mxu3 %v2015_v9 }
  0xa0   : > { %579 = vmatmul.bf16.gmra.mxu0 %v2274_v8  ;;  %708 = vmatmul.bf16.vlgmr.msrb.gmra.mxu3 %v3030_v11 }
  0xa1   : > { %668 = vmatmul.bf16.gmra.mxu1 %v2274_v8 }
  0xa2   : > { %757 = vmatmul.bf16.gmra.mxu2 %v2274_v8  ;;  %v2281_v8 = vld [vmem:[%s2982_s8 + $0x58] sm:$0xff] }
  0xb0   : > { %584 = vmatmul.bf16.gmra.mxu0 %v2275_v17  ;;  %713 = vmatmul.bf16.gmra.mxu3 %v3039_v13 }
  0xb1   : > { %673 = vmatmul.bf16.gmra.mxu1 %v2275_v17 }
  0xb2   : > { %762 = vmatmul.bf16.gmra.mxu2 %v2275_v17 }
  0xc0   : > { %589 = vmatmul.bf16.gmra.mxu0 %v2276_v18  ;;  %718 = vmatmul.bf16.gmra.mxu3 %v3044_v14 }
  0xc1   : > { %678 = vmatmul.bf16.gmra.mxu1 %v2276_v18 }
  0xc2   : > { %767 = vmatmul.bf16.gmra.mxu2 %v2276_v18 }
  0xd0   : > { %594 = vmatmul.bf16.gmra.mxu0 %v2277_v19  ;;  %723 = vmatmul.bf16.gmra.mxu3 %v3053_v16 }
  0xd1   : > { %683 = vmatmul.bf16.gmra.mxu1 %v2277_v19 }
  0xd2   : > { %772 = vmatmul.bf16.gmra.mxu2 %v2277_v19 }
  0xdd   : > { %v560_v24 = vpop.f32.mrf.mxu0 }
  0xde   : > { %v561_v25 = vadd.f32 %v560_v24, %v3069_v21  ;;  %v649_v26 = vpop.f32.mrf.mxu1 }
  0xdf   : > { %v650_v27 = vadd.f32 %v649_v26, %v3071_v22 }
  0xe0   : > { %599 = vmatmul.bf16.gmra.mxu0 %v2278_v23  ;;  %797 = vmatmul.bf16.vlgmr.msra.gmra.mxu3 %v3030_v11 }
  0xe1   : > { %v818_v28 = vpack.c.bf16 %v650_v27, %v561_v25  ;;  %688 = vmatmul.bf16.gmra.mxu1 %v2278_v23 }
  0xe2   : > { %777 = vmatmul.bf16.gmra.mxu2 %v2278_v23 }
  0xe3   : > { %882 = vst [vmem:[#allocation2] sm:$0xff] %v818_v28  ;;  %v3079_v30 = vpop.f32.mrf.mxu3 }
  0xe5   : > { %v738_v31 = vpop.f32.mrf.mxu2  ;;  %v562_v33 = vpop.f32.mrf.mxu0 }
  0xe6   : > { %v739_v32 = vadd.f32 %v738_v31, %v3077_v29  ;;  %v563_v34 = vadd.f32 %v562_v33, %v3069_v21  ;;  %v651_v35 = vpop.f32.mrf.mxu1 }
  0xe7   : > { %v652_v37 = vadd.f32 %v651_v35, %v3071_v22 }
  0xe8   : > { %v819_v36 = vpack.c.bf16 %v739_v32, %v739_v32 }
  0xe9   : > { %v820_v38 = vpack.c.bf16 %v652_v37, %v563_v34 }
  0xea   : > { %883 = vst [vmem:[#allocation2 + $0x8] sm:$0xf] %v819_v36 }
  0xeb   : > { %884 = vst [vmem:[#allocation2 + $0xc] sm:$0xff] %v820_v38  ;;  %v3084_v39 = vpop.f32.mrf.mxu3 }
  0xed   : > { %v740_v40 = vpop.f32.mrf.mxu2  ;;  %v565_v43 = vpop.f32.mrf.mxu0 }
  0xee   : > { %v741_v42 = vadd.f32 %v740_v40, %v3077_v29  ;;  %v566_v44 = vadd.f32 %v565_v43, %v3069_v21  ;;  %v654_v45 = vpop.f32.mrf.mxu1 }
  0xef   : > { %v655_v47 = vadd.f32 %v654_v45, %v3071_v22 }
  0xf0   : > { %v821_v46 = vpack.c.bf16 %v741_v42, %v741_v42  ;;  %604 = vmatmul.bf16.gmra.mxu0 %v2279_v41  ;;  %802 = vmatmul.bf16.gmra.mxu3 %v3039_v13 }
  0xf1   : > { %v822_v48 = vpack.c.bf16 %v655_v47, %v566_v44  ;;  %693 = vmatmul.bf16.gmra.mxu1 %v2279_v41  ;;  %v621_v47 = vadd.f32 %v3079_v30, %v3069_v21  ;;  %v623_v30 = vadd.f32 %v3084_v39, %v3069_v21 }
  0xf2   : > { %885 = vst [vmem:[#allocation2 + $0x14] sm:$0xf] %v821_v46  ;;  %782 = vmatmul.bf16.gmra.mxu2 %v2279_v41 }
  0xf3   : > { %886 = vst [vmem:[#allocation2 + $0x18] sm:$0xff] %v822_v48  ;;  %v3091_v49 = vpop.f32.mrf.mxu3 }
  0xf4   : > { %v626_v39 = vadd.f32 %v3091_v49, %v3069_v21 }
  0xf5   : > { %v743_v50 = vpop.f32.mrf.mxu2  ;;  %v567_v52 = vpop.f32.mrf.mxu0 }
  0xf6   : > { %v744_v51 = vadd.f32 %v743_v50, %v3077_v29  ;;  %v568_v53 = vadd.f32 %v567_v52, %v3069_v21  ;;  %v656_v54 = vpop.f32.mrf.mxu1 }
  0xf7   : > { %v657_v56 = vadd.f32 %v656_v54, %v3071_v22 }
  0xf8   : > { %v823_v55 = vpack.c.bf16 %v744_v51, %v744_v51 }
  0xf9   : > { %v824_v57 = vpack.c.bf16 %v657_v56, %v568_v53 }
  0xfa   : > { %887 = vst [vmem:[#allocation2 + $0x20] sm:$0xf] %v823_v55 }
  0xfb   : > { %888 = vst [vmem:[#allocation2 + $0x24] sm:$0xff] %v824_v57  ;;  %v3096_v58 = vpop.f32.mrf.mxu3 }
  0xfc   : > { %v628_v49 = vadd.f32 %v3096_v58, %v3069_v21 }
  0xfd   : > { %v745_v59 = vpop.f32.mrf.mxu2  ;;  %v570_v62 = vpop.f32.mrf.mxu0 }
  0xfe   : > { %v746_v61 = vadd.f32 %v745_v59, %v3077_v29  ;;  %v571_v63 = vadd.f32 %v570_v62, %v3069_v21  ;;  %v659_v0 = vpop.f32.mrf.mxu1 }
  0xff   : > { %v660_v2 = vadd.f32 %v659_v0, %v3071_v22 }
 0x100   : > { %v825_v1 = vpack.c.bf16 %v746_v61, %v746_v61  ;;  %609 = vmatmul.bf16.gmra.mxu0 %v2280_v60  ;;  %807 = vmatmul.bf16.gmra.mxu3 %v3044_v14 }
 0x101   : > { %v826_v3 = vpack.c.bf16 %v660_v2, %v571_v63  ;;  %698 = vmatmul.bf16.gmra.mxu1 %v2280_v60 }
 0x102   : > { %889 = vst [vmem:[#allocation2 + $0x2c] sm:$0xf] %v825_v1  ;;  %787 = vmatmul.bf16.gmra.mxu2 %v2280_v60 }
 0x103   : > { %890 = vst [vmem:[#allocation2 + $0x30] sm:$0xff] %v826_v3  ;;  %v3103_v4 = vpop.f32.mrf.mxu3 }
 0x104   : > { %v631_v58 = vadd.f32 %v3103_v4, %v3069_v21 }
 0x105   : > { %v748_v5 = vpop.f32.mrf.mxu2  ;;  %v572_v9 = vpop.f32.mrf.mxu0 }
 0x106   : > { %v749_v6 = vadd.f32 %v748_v5, %v3077_v29  ;;  %v573_v10 = vadd.f32 %v572_v9, %v3069_v21  ;;  %v661_v11 = vpop.f32.mrf.mxu1 }
 0x107   : > { %v662_v13 = vadd.f32 %v661_v11, %v3071_v22 }
 0x108   : > { %v827_v12 = vpack.c.bf16 %v749_v6, %v749_v6 }
 0x109   : > { %v828_v7 = vpack.c.bf16 %v662_v13, %v573_v10 }
 0x10a   : > { %891 = vst [vmem:[#allocation2 + $0x38] sm:$0xf] %v827_v12 }
 0x10b   : > { %892 = vst [vmem:[#allocation2 + $0x3c] sm:$0xff] %v828_v7  ;;  %v3108_v14 = vpop.f32.mrf.mxu3 }
 0x10c   : > { %v633_v4 = vadd.f32 %v3108_v14, %v3069_v21 }
 0x10d   : > { %v750_v15 = vpop.f32.mrf.mxu2  ;;  %v575_v18 = vpop.f32.mrf.mxu0 }
 0x10e   : > { %v751_v17 = vadd.f32 %v750_v15, %v3077_v29  ;;  %v576_v19 = vadd.f32 %v575_v18, %v3069_v21  ;;  %v664_v20 = vpop.f32.mrf.mxu1 }
 0x10f   : > { %v665_v24 = vadd.f32 %v664_v20, %v3071_v22 }
 0x110   : > { %v829_v23 = vpack.c.bf16 %v751_v17, %v751_v17  ;;  %614 = vmatmul.bf16.gmra.mxu0 %v2281_v8  ;;  %812 = vmatmul.bf16.gmra.mxu3 %v3053_v16 }
 0x111   : > { %v830_v25 = vpack.c.bf16 %v665_v24, %v576_v19  ;;  %703 = vmatmul.bf16.gmra.mxu1 %v2281_v8 }
 0x112   : > { %893 = vst [vmem:[#allocation2 + $0x44] sm:$0xf] %v829_v23  ;;  %792 = vmatmul.bf16.gmra.mxu2 %v2281_v8 }
 0x113   : > { %894 = vst [vmem:[#allocation2 + $0x48] sm:$0xff] %v830_v25  ;;  %v3115_v26 = vpop.f32.mrf.mxu3 }
 0x114   : > { %v636_v14 = vadd.f32 %v3115_v26, %v3069_v21 }
 0x115   : > { %v753_v27 = vpop.f32.mrf.mxu2  ;;  %v577_v31 = vpop.f32.mrf.mxu0 }
 0x116   : > { %v754_v28 = vadd.f32 %v753_v27, %v3077_v29  ;;  %v578_v32 = vadd.f32 %v577_v31, %v3069_v21  ;;  %v666_v33 = vpop.f32.mrf.mxu1 }
 0x117   : > { %v667_v35 = vadd.f32 %v666_v33, %v3071_v22 }
 0x118   : > { %v831_v34 = vpack.c.bf16 %v754_v28, %v754_v28 }
 0x119   : > { %v832_v36 = vpack.c.bf16 %v667_v35, %v578_v32 }
 0x11a   : > { %895 = vst [vmem:[#allocation2 + $0x50] sm:$0xf] %v831_v34 }
 0x11b   : > { %896 = vst [vmem:[#allocation2 + $0x54] sm:$0xff] %v832_v36  ;;  %v3120_v16 = vpop.f32.mrf.mxu3 }
 0x11c   : > { %v638_v26 = vadd.f32 %v3120_v16, %v3069_v21 }
 0x11d   : > { %v755_v37 = vpop.f32.mrf.mxu2  ;;  %v580_v40 = vpop.f32.mrf.mxu0 }
 0x11e   : > { %v756_v38 = vadd.f32 %v755_v37, %v3077_v29  ;;  %v581_v41 = vadd.f32 %v580_v40, %v3069_v21  ;;  %v669_v42 = vpop.f32.mrf.mxu1 }
 0x11f   : > { %v670_v44 = vadd.f32 %v669_v42, %v3071_v22 }
 0x120   : > { %v833_v43 = vpack.c.bf16 %v756_v38, %v756_v38 }
 0x121   : > { %v834_v45 = vpack.c.bf16 %v670_v44, %v581_v41 }
 0x122   : > { %897 = vst [vmem:[#allocation2 + $0x5c] sm:$0xf] %v833_v43 }
 0x123   : > { %898 = vst [vmem:[#allocation2 + $0x60] sm:$0xff] %v834_v45  ;;  %v709_v46 = vpop.f32.mrf.mxu3 }
 0x124   : > { %v710_v48 = vadd.f32 %v709_v46, %v3071_v22 }
 0x125   : > { %v758_v50 = vpop.f32.mrf.mxu2  ;;  %v582_v52 = vpop.f32.mrf.mxu0 }
 0x126   : > { %v759_v51 = vadd.f32 %v758_v50, %v3077_v29  ;;  %v866_v53 = vpack.c.bf16 %v710_v48, %v621_v47  ;;  %v583_v54 = vadd.f32 %v582_v52, %v3069_v21  ;;  %v671_v55 = vpop.f32.mrf.mxu1 }
 0x127   : > { %v672_v57 = vadd.f32 %v671_v55, %v3071_v22 }
 0x128   : > { %v835_v56 = vpack.c.bf16 %v759_v51, %v759_v51  ;;  %930 = vst [vmem:[#allocation2 + $0x120] sm:$0xff] %v866_v53 }
 0x129   : > { %v836_v59 = vpack.c.bf16 %v672_v57, %v583_v54 }
 0x12a   : > { %899 = vst [vmem:[#allocation2 + $0x68] sm:$0xf] %v835_v56 }
 0x12b   : > { %900 = vst [vmem:[#allocation2 + $0x6c] sm:$0xff] %v836_v59  ;;  %v711_v60 = vpop.f32.mrf.mxu3 }
 0x12c   : > { %v712_v61 = vadd.f32 %v711_v60, %v3071_v22 }
 0x12d   : > { %v760_v62 = vpop.f32.mrf.mxu2  ;;  %v585_v0 = vpop.f32.mrf.mxu0 }
 0x12e   : > { %v761_v63 = vadd.f32 %v760_v62, %v3077_v29  ;;  %v868_v1 = vpack.c.bf16 %v712_v61, %v623_v30  ;;  %v586_v2 = vadd.f32 %v585_v0, %v3069_v21  ;;  %v674_v3 = vpop.f32.mrf.mxu1 }
 0x12f   : > { %v675_v6 = vadd.f32 %v674_v3, %v3071_v22 }
 0x130   : > { %v837_v5 = vpack.c.bf16 %v761_v63, %v761_v63  ;;  %932 = vst [vmem:[#allocation2 + $0x12c] sm:$0xff] %v868_v1 }
 0x131   : > { %v838_v9 = vpack.c.bf16 %v675_v6, %v586_v2 }
 0x132   : > { %901 = vst [vmem:[#allocation2 + $0x74] sm:$0xf] %v837_v5 }
 0x133   : > { %902 = vst [vmem:[#allocation2 + $0x78] sm:$0xff] %v838_v9  ;;  %v714_v10 = vpop.f32.mrf.mxu3 }
 0x134   : > { %v715_v11 = vadd.f32 %v714_v10, %v3071_v22 }
 0x135   : > { %v763_v12 = vpop.f32.mrf.mxu2  ;;  %v587_v7 = vpop.f32.mrf.mxu0 }
 0x136   : > { %v764_v13 = vadd.f32 %v763_v12, %v3077_v29  ;;  %v870_v15 = vpack.c.bf16 %v715_v11, %v626_v39  ;;  %v588_v8 = vadd.f32 %v587_v7, %v3069_v21  ;;  %v676_v17 = vpop.f32.mrf.mxu1 }
 0x137   : > { %v677_v19 = vadd.f32 %v676_v17, %v3071_v22 }
 0x138   : > { %v839_v18 = vpack.c.bf16 %v764_v13, %v764_v13  ;;  %934 = vst [vmem:[#allocation2 + $0x138] sm:$0xff] %v870_v15 }
 0x139   : > { %v840_v20 = vpack.c.bf16 %v677_v19, %v588_v8 }
 0x13a   : > { %903 = vst [vmem:[#allocation2 + $0x80] sm:$0xf] %v839_v18 }
 0x13b   : > { %904 = vst [vmem:[#allocation2 + $0x84] sm:$0xff] %v840_v20  ;;  %v716_v23 = vpop.f32.mrf.mxu3 }
 0x13c   : > { %v717_v24 = vadd.f32 %v716_v23, %v3071_v22 }
 0x13d   : > { %v765_v25 = vpop.f32.mrf.mxu2  ;;  %v590_v28 = vpop.f32.mrf.mxu0 }
 0x13e   : > { %v766_v27 = vadd.f32 %v765_v25, %v3077_v29  ;;  %v872_v31 = vpack.c.bf16 %v717_v24, %v628_v49  ;;  %v591_v32 = vadd.f32 %v590_v28, %v3069_v21  ;;  %v679_v33 = vpop.f32.mrf.mxu1 }
 0x13f   : > { %v680_v35 = vadd.f32 %v679_v33, %v3071_v22 }
 0x140   : > { %v841_v34 = vpack.c.bf16 %v766_v27, %v766_v27  ;;  %936 = vst [vmem:[#allocation2 + $0x144] sm:$0xff] %v872_v31 }
 0x141   : > { %v842_v36 = vpack.c.bf16 %v680_v35, %v591_v32 }
 0x142   : > { %905 = vst [vmem:[#allocation2 + $0x8c] sm:$0xf] %v841_v34 }
 0x143   : > { %906 = vst [vmem:[#allocation2 + $0x90] sm:$0xff] %v842_v36  ;;  %v719_v37 = vpop.f32.mrf.mxu3 }
 0x144   : > { %v720_v38 = vadd.f32 %v719_v37, %v3071_v22 }
 0x145   : > { %v768_v40 = vpop.f32.mrf.mxu2  ;;  %v592_v42 = vpop.f32.mrf.mxu0 }
 0x146   : > { %v769_v41 = vadd.f32 %v768_v40, %v3077_v29  ;;  %v874_v43 = vpack.c.bf16 %v720_v38, %v631_v58  ;;  %v593_v44 = vadd.f32 %v592_v42, %v3069_v21  ;;  %v681_v45 = vpop.f32.mrf.mxu1 }
 0x147   : > { %v682_v47 = vadd.f32 %v681_v45, %v3071_v22 }
 0x148   : > { %v843_v46 = vpack.c.bf16 %v769_v41, %v769_v41  ;;  %938 = vst [vmem:[#allocation2 + $0x150] sm:$0xff] %v874_v43 }
 0x149   : > { %v844_v48 = vpack.c.bf16 %v682_v47, %v593_v44 }
 0x14a   : > { %907 = vst [vmem:[#allocation2 + $0x98] sm:$0xf] %v843_v46 }
 0x14b   : > { %908 = vst [vmem:[#allocation2 + $0x9c] sm:$0xff] %v844_v48  ;;  %v721_v50 = vpop.f32.mrf.mxu3 }
 0x14c   : > { %v722_v51 = vadd.f32 %v721_v50, %v3071_v22 }
 0x14d   : > { %v770_v52 = vpop.f32.mrf.mxu2  ;;  %v595_v54 = vpop.f32.mrf.mxu0 }
 0x14e   : > { %v771_v53 = vadd.f32 %v770_v52, %v3077_v29  ;;  %v876_v55 = vpack.c.bf16 %v722_v51, %v633_v4  ;;  %v596_v56 = vadd.f32 %v595_v54, %v3069_v21  ;;  %v684_v57 = vpop.f32.mrf.mxu1 }
 0x14f   : > { %v685_v60 = vadd.f32 %v684_v57, %v3071_v22 }
 0x150   : > { %v845_v59 = vpack.c.bf16 %v771_v53, %v771_v53  ;;  %940 = vst [vmem:[#allocation2 + $0x15c] sm:$0xff] %v876_v55 }
 0x151   : > { %v846_v30 = vpack.c.bf16 %v685_v60, %v596_v56 }
 0x152   : > { %909 = vst [vmem:[#allocation2 + $0xa4] sm:$0xf] %v845_v59 }
 0x153   : > { %910 = vst [vmem:[#allocation2 + $0xa8] sm:$0xff] %v846_v30  ;;  %v724_v61 = vpop.f32.mrf.mxu3 }
 0x154   : > { %v725_v62 = vadd.f32 %v724_v61, %v3071_v22 }
 0x155   : > { %v773_v63 = vpop.f32.mrf.mxu2  ;;  %v597_v1 = vpop.f32.mrf.mxu0 }
 0x156   : > { %v774_v0 = vadd.f32 %v773_v63, %v3077_v29  ;;  %v878_v2 = vpack.c.bf16 %v725_v62, %v636_v14  ;;  %v598_v3 = vadd.f32 %v597_v1, %v3069_v21  ;;  %v686_v5 = vpop.f32.mrf.mxu1 }
 0x157   : > { %v687_v9 = vadd.f32 %v686_v5, %v3071_v22 }
 0x158   : > { %v847_v6 = vpack.c.bf16 %v774_v0, %v774_v0  ;;  %942 = vst [vmem:[#allocation2 + $0x168] sm:$0xff] %v878_v2 }
 0x159   : > { %v848_v10 = vpack.c.bf16 %v687_v9, %v598_v3 }
 0x15a   : > { %911 = vst [vmem:[#allocation2 + $0xb0] sm:$0xf] %v847_v6 }
 0x15b   : > { %912 = vst [vmem:[#allocation2 + $0xb4] sm:$0xff] %v848_v10  ;;  %v726_v39 = vpop.f32.mrf.mxu3 }
 0x15c   : > { %v727_v11 = vadd.f32 %v726_v39, %v3071_v22 }
 0x15d   : > { %v775_v12 = vpop.f32.mrf.mxu2  ;;  %v600_v7 = vpop.f32.mrf.mxu0 }
 0x15e   : > { %v776_v13 = vadd.f32 %v775_v12, %v3077_v29  ;;  %v880_v15 = vpack.c.bf16 %v727_v11, %v638_v26  ;;  %v601_v8 = vadd.f32 %v600_v7, %v3069_v21  ;;  %v689_v17 = vpop.f32.mrf.mxu1 }
 0x15f   : > { %v690_v19 = vadd.f32 %v689_v17, %v3071_v22 }
 0x160   : > { %v849_v18 = vpack.c.bf16 %v776_v13, %v776_v13  ;;  %944 = vst [vmem:[#allocation2 + $0x174] sm:$0xff] %v880_v15 }
 0x161   : > { %v850_v20 = vpack.c.bf16 %v690_v19, %v601_v8 }
 0x162   : > { %913 = vst [vmem:[#allocation2 + $0xbc] sm:$0xf] %v849_v18 }
 0x163   : > { %914 = vst [vmem:[#allocation2 + $0xc0] sm:$0xff] %v850_v20  ;;  %v798_v23 = vpop.f32.mrf.mxu3 }
 0x164   : > { %v799_v16 = vadd.f32 %v798_v23, %v3077_v29 }
 0x165   : > { %v778_v49 = vpop.f32.mrf.mxu2  ;;  %v602_v25 = vpop.f32.mrf.mxu0 }
 0x166   : > { %v779_v24 = vadd.f32 %v778_v49, %v3077_v29  ;;  %v867_v27 = vpack.c.bf16 %v799_v16, %v799_v16  ;;  %v603_v28 = vadd.f32 %v602_v25, %v3069_v21  ;;  %v691_v31 = vpop.f32.mrf.mxu1 }
 0x167   : > { %v692_v33 = vadd.f32 %v691_v31, %v3071_v22 }
 0x168   : > { %v851_v32 = vpack.c.bf16 %v779_v24, %v779_v24  ;;  %931 = vst [vmem:[#allocation2 + $0x128] sm:$0xf] %v867_v27 }
 0x169   : > { %v852_v34 = vpack.c.bf16 %v692_v33, %v603_v28 }
 0x16a   : > { %915 = vst [vmem:[#allocation2 + $0xc8] sm:$0xf] %v851_v32 }
 0x16b   : > { %916 = vst [vmem:[#allocation2 + $0xcc] sm:$0xff] %v852_v34  ;;  %v800_v35 = vpop.f32.mrf.mxu3 }
 0x16c   : > { %v801_v37 = vadd.f32 %v800_v35, %v3077_v29 }
 0x16d   : > { %v780_v36 = vpop.f32.mrf.mxu2  ;;  %v605_v38 = vpop.f32.mrf.mxu0 }
 0x16e   : > { %v781_v58 = vadd.f32 %v780_v36, %v3077_v29  ;;  %v869_v40 = vpack.c.bf16 %v801_v37, %v801_v37  ;;  %v606_v41 = vadd.f32 %v605_v38, %v3069_v21  ;;  %v694_v42 = vpop.f32.mrf.mxu1 }
 0x16f   : > { %v695_v44 = vadd.f32 %v694_v42, %v3071_v22 }
 0x170   : > { %v853_v43 = vpack.c.bf16 %v781_v58, %v781_v58  ;;  %933 = vst [vmem:[#allocation2 + $0x134] sm:$0xf] %v869_v40 }
 0x171   : > { %v854_v45 = vpack.c.bf16 %v695_v44, %v606_v41 }
 0x172   : > { %917 = vst [vmem:[#allocation2 + $0xd4] sm:$0xf] %v853_v43 }
 0x173   : > { %918 = vst [vmem:[#allocation2 + $0xd8] sm:$0xff] %v854_v45  ;;  %v803_v46 = vpop.f32.mrf.mxu3 }
 0x174   : > { %v804_v48 = vadd.f32 %v803_v46, %v3077_v29 }
 0x175   : > { %v783_v47 = vpop.f32.mrf.mxu2  ;;  %v607_v4 = vpop.f32.mrf.mxu0 }
 0x176   : > { %v784_v50 = vadd.f32 %v783_v47, %v3077_v29  ;;  %v871_v51 = vpack.c.bf16 %v804_v48, %v804_v48  ;;  %v608_v52 = vadd.f32 %v607_v4, %v3069_v21  ;;  %v696_v53 = vpop.f32.mrf.mxu1 }
 0x177   : > { %v697_v55 = vadd.f32 %v696_v53, %v3071_v22 }
 0x178   : > { %v855_v54 = vpack.c.bf16 %v784_v50, %v784_v50  ;;  %935 = vst [vmem:[#allocation2 + $0x140] sm:$0xf] %v871_v51 }
 0x179   : > { %v856_v56 = vpack.c.bf16 %v697_v55, %v608_v52 }
 0x17a   : > { %919 = vst [vmem:[#allocation2 + $0xe0] sm:$0xf] %v855_v54 }
 0x17b   : > { %920 = vst [vmem:[#allocation2 + $0xe4] sm:$0xff] %v856_v56  ;;  %v805_v57 = vpop.f32.mrf.mxu3 }
 0x17c   : > { %v806_v60 = vadd.f32 %v805_v57, %v3077_v29 }
 0x17d   : > { %v785_v59 = vpop.f32.mrf.mxu2  ;;  %v610_v61 = vpop.f32.mrf.mxu0 }
 0x17e   : > { %v786_v30 = vadd.f32 %v785_v59, %v3077_v29  ;;  %v873_v14 = vpack.c.bf16 %v806_v60, %v806_v60  ;;  %v611_v62 = vadd.f32 %v610_v61, %v3069_v21  ;;  %v699_v63 = vpop.f32.mrf.mxu1 }
 0x17f   : > { %v700_v1 = vadd.f32 %v699_v63, %v3071_v22 }
 0x180   : > { %v857_v0 = vpack.c.bf16 %v786_v30, %v786_v30  ;;  %937 = vst [vmem:[#allocation2 + $0x14c] sm:$0xf] %v873_v14 }
 0x181   : > { %v858_v2 = vpack.c.bf16 %v700_v1, %v611_v62 }
 0x182   : > { %921 = vst [vmem:[#allocation2 + $0xec] sm:$0xf] %v857_v0 }
 0x183   : > { %922 = vst [vmem:[#allocation2 + $0xf0] sm:$0xff] %v858_v2  ;;  %v808_v3 = vpop.f32.mrf.mxu3 }
 0x184   : > { %v809_v6 = vadd.f32 %v808_v3, %v3077_v29 }
 0x185   : > { %v788_v5 = vpop.f32.mrf.mxu2  ;;  %v612_v10 = vpop.f32.mrf.mxu0 }
 0x186   : > { %v789_v9 = vadd.f32 %v788_v5, %v3077_v29  ;;  %v875_v39 = vpack.c.bf16 %v809_v6, %v809_v6  ;;  %v613_v26 = vadd.f32 %v612_v10, %v3069_v21  ;;  %v701_v11 = vpop.f32.mrf.mxu1 }
 0x187   : > { %v702_v13 = vadd.f32 %v701_v11, %v3071_v22 }
 0x188   : > { %v859_v12 = vpack.c.bf16 %v789_v9, %v789_v9  ;;  %939 = vst [vmem:[#allocation2 + $0x158] sm:$0xf] %v875_v39 }
 0x189   : > { %v860_v7 = vpack.c.bf16 %v702_v13, %v613_v26 }
 0x18a   : > { %923 = vst [vmem:[#allocation2 + $0xf8] sm:$0xf] %v859_v12 }
 0x18b   : > { %924 = vst [vmem:[#allocation2 + $0xfc] sm:$0xff] %v860_v7  ;;  %v810_v15 = vpop.f32.mrf.mxu3 }
 0x18c   : > { %v811_v17 = vadd.f32 %v810_v15, %v3077_v29 }
 0x18d   : > { %v790_v8 = vpop.f32.mrf.mxu2  ;;  %v615_v19 = vpop.f32.mrf.mxu0 }
 0x18e   : > { %v791_v18 = vadd.f32 %v790_v8, %v3077_v29  ;;  %v877_v20 = vpack.c.bf16 %v811_v17, %v811_v17  ;;  %v616_v23 = vadd.f32 %v615_v19, %v3069_v21  ;;  %v704_v49 = vpop.f32.mrf.mxu1 }
 0x18f   : > { %v705_v24 = vadd.f32 %v704_v49, %v3071_v22 }
 0x190   : > { %v861_v16 = vpack.c.bf16 %v791_v18, %v791_v18  ;;  %941 = vst [vmem:[#allocation2 + $0x164] sm:$0xf] %v877_v20 }
 0x191   : > { %v862_v25 = vpack.c.bf16 %v705_v24, %v616_v23 }
 0x192   : > { %925 = vst [vmem:[#allocation2 + $0x104] sm:$0xf] %v861_v16 }
 0x193   : > { %926 = vst [vmem:[#allocation2 + $0x108] sm:$0xff] %v862_v25  ;;  %v813_v27 = vpop.f32.mrf.mxu3 }
 0x194   : > { %v814_v31 = vadd.f32 %v813_v27, %v3077_v29 }
 0x195   : > { %v793_v28 = vpop.f32.mrf.mxu2  ;;  %v617_v33 = vpop.f32.mrf.mxu0 }
 0x196   : > { %v794_v32 = vadd.f32 %v793_v28, %v3077_v29  ;;  %v879_v34 = vpack.c.bf16 %v814_v31, %v814_v31  ;;  %v618_v35 = vadd.f32 %v617_v33, %v3069_v21  ;;  %v706_v36 = vpop.f32.mrf.mxu1 }
 0x197   : > { %v707_v58 = vadd.f32 %v706_v36, %v3071_v22 }
 0x198   : > { %v863_v37 = vpack.c.bf16 %v794_v32, %v794_v32  ;;  %943 = vst [vmem:[#allocation2 + $0x170] sm:$0xf] %v879_v34 }
 0x199   : > { %v864_v38 = vpack.c.bf16 %v707_v58, %v618_v35 }
 0x19a   : > { %927 = vst [vmem:[#allocation2 + $0x110] sm:$0xf] %v863_v37 }
 0x19b   : > { %928 = vst [vmem:[#allocation2 + $0x114] sm:$0xff] %v864_v38  ;;  %v815_v40 = vpop.f32.mrf.mxu3 }
 0x19c   : > { %v816_v42 = vadd.f32 %v815_v40, %v3077_v29 }
 0x19d   : > { %v795_v41 = vpop.f32.mrf.mxu2 }
 0x19e   : > { %v796_v43 = vadd.f32 %v795_v41, %v3077_v29  ;;  %v881_v44 = vpack.c.bf16 %v816_v42, %v816_v42 }
 0x1a0   : > { %v865_v45 = vpack.c.bf16 %v796_v43, %v796_v43  ;;  %945 = vst [vmem:[#allocation2 + $0x17c] sm:$0xf] %v881_v44 }
 0x1a2   : > { %929 = vst [vmem:[#allocation2 + $0x11c] sm:$0xf] %v865_v45 }
 0x1a3 PF: > { %v2164_v21 = vld [vmem:[#allocation2 + $0xac] sm:$0xf]  ;;  %v2326_v46 = vld [vmem:[#allocation2 + $0xb4] sm:$0xf0]  ;;  %v2160_v4 = vld [vmem:[#allocation2 + $0x94] sm:$0xf] }
 0x1a4   : > { %v2196_v47 = vld [vmem:[#allocation2 + $0x16c] sm:$0xf]  ;;  %v2165_v48 = vor.u32 %v2326_v46, %v2164_v21  ;;  %v2334_v22 = vld [vmem:[#allocation2 + $0x174] sm:$0xf0]  ;;  %v2325_v51 = vld [vmem:[#allocation2 + $0x9c] sm:$0xf0] }
 0x1a5   : > { %v2197_v50 = vor.u32 %v2334_v22, %v2196_v47  ;;  %v2192_v52 = vld [vmem:[#allocation2 + $0x154] sm:$0xf]  ;;  %v2333_v53 = vld [vmem:[#allocation2 + $0x15c] sm:$0xf0]  ;;  %v2161_v54 = vor.u32 %v2325_v51, %v2160_v4  ;;  %v2156_v29 = vld [vmem:[#allocation2 + $0x7c] sm:$0xf] }
 0x1a6   : > { %1176 = vmatpush.bf16.xpose.msra.mxu0 %v2165_v48  ;;  %v2193_v55 = vor.u32 %v2333_v53, %v2192_v52  ;;  %v2324_v56 = vld [vmem:[#allocation2 + $0x84] sm:$0xf0]  ;;  %v2188_v57 = vld [vmem:[#allocation2 + $0x13c] sm:$0xf]  ;;  %v2152_v61 = vld [vmem:[#allocation2 + $0x64] sm:$0xf] }
 0x1a7   : > { %1225 = vmatpush.bf16.xpose.msra.mxu1 %v2197_v50  ;;  %v2332_v59 = vld [vmem:[#allocation2 + $0x144] sm:$0xf0]  ;;  %v2157_v60 = vor.u32 %v2324_v56, %v2156_v29  ;;  %v2323_v14 = vld [vmem:[#allocation2 + $0x6c] sm:$0xf0]  ;;  %v2184_v62 = vld [vmem:[#allocation2 + $0x124] sm:$0xf] }
 0x1a8   : > { %v2189_v30 = vor.u32 %v2332_v59, %v2188_v57  ;;  %v2331_v63 = vld [vmem:[#allocation2 + $0x12c] sm:$0xf0]  ;;  %v2153_v0 = vor.u32 %v2323_v14, %v2152_v61  ;;  %v2148_v2 = vld [vmem:[#allocation2 + $0x4c] sm:$0xf]  ;;  %v2322_v3 = vld [vmem:[#allocation2 + $0x54] sm:$0xf0] }
 0x1a9   : > { %v2185_v1 = vor.u32 %v2331_v63, %v2184_v62  ;;  %v2180_v5 = vld [vmem:[#allocation2 + $0x10c] sm:$0xf]  ;;  %v2330_v6 = vld [vmem:[#allocation2 + $0x114] sm:$0xf0]  ;;  %v2149_v9 = vor.u32 %v2322_v3, %v2148_v2  ;;  %v2144_v39 = vld [vmem:[#allocation2 + $0x34] sm:$0xf] }
 0x1aa   : > { %v2181_v10 = vor.u32 %v2330_v6, %v2180_v5  ;;  %v2321_v26 = vld [vmem:[#allocation2 + $0x3c] sm:$0xf0]  ;;  %v2176_v11 = vld [vmem:[#allocation2 + $0xf4] sm:$0xf]  ;;  %v2140_v15 = vld [vmem:[#allocation2 + $0x1c] sm:$0xf] }
 0x1ab   : > { %v2329_v12 = vld [vmem:[#allocation2 + $0xfc] sm:$0xf0]  ;;  %v2145_v13 = vor.u32 %v2321_v26, %v2144_v39  ;;  %v2320_v8 = vld [vmem:[#allocation2 + $0x24] sm:$0xf0]  ;;  %v2172_v17 = vld [vmem:[#allocation2 + $0xdc] sm:$0xf] }
 0x1ac   : > { %v2177_v7 = vor.u32 %v2329_v12, %v2176_v11  ;;  %v2328_v18 = vld [vmem:[#allocation2 + $0xe4] sm:$0xf0]  ;;  %s2100_s6 = sshll.u32 %s2799_s23, 7  ;;  %v2141_v19 = vor.u32 %v2320_v8, %v2140_v15  ;;  %v2136_v23 = vld [vmem:[#allocation2 + $0x4] sm:$0xf]  ;;  %s1758_s10 = sld [smem:[#allocation3]] }
 0x1ad   : > { %v2173_v20 = vor.u32 %v2328_v18, %v2172_v17  ;;  %s3204_s7 = sshra.s32 %s2100_s6, 3  ;;  %v2319_v49 = vld [vmem:[#allocation2 + $0xc] sm:$0xf0]  ;;  %v2168_v16 = vld [vmem:[#allocation2 + $0xc4] sm:$0xf]  ;;  %s2264_s13 = sshll.u32 %s2799_s23, 4 }
 0x1ae   : > { %1177 = vmatpush.bf16.xpose.msra.mxu0 %v2161_v54  ;;  %s2310_s16 = smul.u32 12, %s3204_s7  ;;  %v2327_v24 = vld [vmem:[#allocation2 + $0xcc] sm:$0xf0]  ;;  %v2137_v25 = vor.u32 %v2319_v49, %v2136_v23  ;;  %s2262_s9 = sshll.u32 %s3204_s7, 2 }
 0x1af   : > { %1226 = vmatpush.bf16.xpose.msra.mxu1 %v2193_v55  ;;  %v2169_v27 = vor.u32 %v2327_v24, %v2168_v16  ;;  %s3447_s12 = scalar_lea.vmem %s2982_s8, %s2262_s9 [#allocation4]  ;;  %s2265_s28 = sshll.u32 %s2803_s3, 5 }
 0x1b0   : > { %s3207_s27 = scalar_lea.vmem [#allocation2], %s2310_s16  ;;  %s1820_s11 = sadd.s32 %s2265_s28, %s2264_s13 }
 0x1b1   : > { %v2104_v28 = vld [vmem:[%s3207_s27] sm:$0xf]  ;;  %v2311_v31 = vld [vmem:[%s3207_s27 + $0x8] sm:$0xf0]  ;;  %v2108_v33 = vld [vmem:[%s3207_s27 + $0x18] sm:$0xf] }
 0x1b2   : > { %v2105_v32 = vor.u32 %v2311_v31, %v2104_v28  ;;  %v2312_v34 = vld [vmem:[%s3207_s27 + $0x20] sm:$0xf0]  ;;  %v2112_v36 = vld [vmem:[%s3207_s27 + $0x30] sm:$0xf]  ;;  %v2313_v37 = vld [vmem:[%s3207_s27 + $0x38] sm:$0xf0] }
 0x1b3   : > { %v2109_v35 = vor.u32 %v2312_v34, %v2108_v33  ;;  %v2113_v58 = vor.u32 %v2313_v37, %v2112_v36  ;;  %v2116_v38 = vld [vmem:[%s3207_s27 + $0x48] sm:$0xf]  ;;  %v2314_v40 = vld [vmem:[%s3207_s27 + $0x50] sm:$0xf0]  ;;  %v2120_v42 = vld [vmem:[%s3207_s27 + $0x60] sm:$0xf] }
 0x1b4   : > { %v2117_v41 = vor.u32 %v2314_v40, %v2116_v38  ;;  %v2315_v43 = vld [vmem:[%s3207_s27 + $0x68] sm:$0xf0]  ;;  %v2124_v45 = vld [vmem:[%s3207_s27 + $0x78] sm:$0xf]  ;;  %v2316_v21 = vld [vmem:[%s3207_s27 + $0x80] sm:$0xf0] }
 0x1b5   : > { %v2121_v44 = vor.u32 %v2315_v43, %v2120_v42  ;;  %v2125_v46 = vor.u32 %v2316_v21, %v2124_v45  ;;  %v2128_v47 = vld [vmem:[%s3207_s27 + $0x90] sm:$0xf]  ;;  %v2317_v48 = vld [vmem:[%s3207_s27 + $0x98] sm:$0xf0]  ;;  %v2132_v55 = vld [vmem:[%s3207_s27 + $0xa8] sm:$0xf] }
 0x1b6   : > { %1178 = vmatpush.bf16.xpose.msra.mxu0 %v2157_v60  ;;  %v2129_v22 = vor.u32 %v2317_v48, %v2128_v47  ;;  %v2318_v29 = vld [vmem:[%s3207_s27 + $0xb0] sm:$0xf0]  ;;  %s2266_s20 = sshll.u32 %s1820_s11, 3  ;;  %s3586_s8 = sld [smem:[#allocation20_spill]] }
 0x1b7   : > { %1227 = vmatpush.bf16.xpose.msra.mxu1 %v2189_v30  ;;  %v2133_v56 = vor.u32 %v2318_v29, %v2132_v55  ;;  %s1823_s3 = sshll.u32 %s2995_s5, 4  ;;  %s1809_s30 = scalar_lea.sflag [#allocation6], %s247_s4  ;;  %s1824_s3 = int_to_ptr.vmem [resolvable:$true] %s1823_s3 }
 0x1bc   : > { %s1822_s17 = scalar_lea.hbm %s3586_s8, %s2266_s20  ;;  %s2709_s9 = scalar_lea.hbm %s3586_s8, 512 }
 0x1bd   : > { %s1825_s29 = sshll.u32 %s1822_s17, 4  ;;  %s1826_s29 = int_to_ptr.hbm [resolvable:$true] %s1825_s29 }
 0x1be   : > { %1179 = vmatpush.bf16.xpose.msra.mxu0 %v2153_v0  ;;  %s2703_s6 = sshra.s32 %s1826_s29, 4  ;;  %s2704_s6 = int_to_ptr.hbm [resolvable:$true] %s2703_s6 }
 0x1bf   : > { %1228 = vmatpush.bf16.xpose.msra.mxu1 %v2185_v1  ;;  %s2705_s7 = scalar_lea.hbm %s2704_s6, 128  ;;  %p2710_p2 = scmp.lt.s32.totalorder %s2704_s6, %s3586_s8 }
 0x1c0   : > { %p2706_p1 = scmp.ne.s32.totalorder %s2704_s6, %s2705_s7  ;;  %p2711_p3 = scmp.lt.s32.totalorder %s2709_s9, %s2705_s7 }
 0x1c2   : > { %p2707_p4 = pnand %p2706_p1, %p2922_p6  ;;  %p2712_p5 = por %p2711_p3, %p2710_p2 }
 0x1c4   : > { %p2708_p0 = pneg %p2707_p4 }
 0x1c6   : > { %1180 = vmatpush.bf16.xpose.msra.mxu0 %v2149_v9  ;;  %p2713_p7 = pnand %p2712_p5, %p2708_p0 }
 0x1c7   : > { %1229 = vmatpush.bf16.xpose.msra.mxu1 %v2181_v10 }
 0x1ce   : > { %1181 = vmatpush.bf16.xpose.msra.mxu0 %v2145_v13 }
 0x1cf   : > { %1230 = vmatpush.bf16.xpose.msra.mxu1 %v2177_v7 }
 0x1d6   : > { %1182 = vmatpush.bf16.xpose.msra.mxu0 %v2141_v19 }
 0x1d7   : > { %1231 = vmatpush.bf16.xpose.msra.mxu1 %v2173_v20 }
 0x1de   : > { %1183 = vmatpush.bf16.xpose.msra.mxu0 %v2137_v25 }
 0x1df   : > { %1232 = vmatpush.bf16.xpose.msra.mxu1 %v2169_v27 }
 0x1e5   : > { %1184 = vmatmul.bf16.vlgmr.msra.gmra.mxu0 %v2105_v32 }
 0x1e6   : > { %1233 = vmatmul.bf16.vlgmr.msra.gmra.mxu1 %v2105_v32 }
 0x1f5   : > { %1189 = vmatmul.bf16.gmra.mxu0 %v2109_v35 }
 0x1f6   : > { %1238 = vmatmul.bf16.gmra.mxu1 %v2109_v35 }
 0x205   : > { %1194 = vmatmul.bf16.gmra.mxu0 %v2113_v58 }
 0x206   : > { %1243 = vmatmul.bf16.gmra.mxu1 %v2113_v58 }
 0x215   : > { %1199 = vmatmul.bf16.gmra.mxu0 %v2117_v41 }
 0x216   : > { %1248 = vmatmul.bf16.gmra.mxu1 %v2117_v41 }
 0x225   : > { %1204 = vmatmul.bf16.gmra.mxu0 %v2121_v44 }
 0x226   : > { %1253 = vmatmul.bf16.gmra.mxu1 %v2121_v44 }
 0x235   : > { %1209 = vmatmul.bf16.gmra.mxu0 %v2125_v46 }
 0x236   : > { %1258 = vmatmul.bf16.gmra.mxu1 %v2125_v46 }
 0x245   : > { %1214 = vmatmul.bf16.gmra.mxu0 %v2129_v22 }
 0x246   : > { %1263 = vmatmul.bf16.gmra.mxu1 %v2129_v22 }
 0x255   : > { %1219 = vmatmul.bf16.gmra.mxu0 %v2133_v56 }
 0x256   : > { %1268 = vmatmul.bf16.gmra.mxu1 %v2133_v56 }
 0x262   : > { %v1185_v50 = vpop.f32.mrf.mxu0 }
 0x263   : > { %v1234_v4 = vpop.f32.mrf.mxu1 }
 0x264   : > { %v1274_v51 = vmax.f32 %v1185_v50, %v1234_v4 }
 0x266   : > { %1275 = vmax.xlane.f32.xlu0 %v1274_v51 }
 0x26a   : > { %v1187_v52 = vpop.f32.mrf.mxu0 }
 0x26b   : > { %v1236_v53 = vpop.f32.mrf.mxu1 }
 0x26c   : > { %v1277_v54 = vmax.f32 %v1187_v52, %v1236_v53 }
 0x26e   : > { %1278 = vmax.xlane.f32.xlu0 %v1277_v54 }
 0x272   : > { %v1190_v57 = vpop.f32.mrf.mxu0 }
 0x273   : > { %v1239_v59 = vpop.f32.mrf.mxu1 }
 0x274   : > { %v1280_v60 = vmax.f32 %v1190_v57, %v1239_v59 }
 0x276   : > { %1281 = vmax.xlane.f32.xlu1 %v1280_v60 }
 0x27a   : > { %v3225_v30 = vpop.f32.mrf.mxu0 }
 0x27b   : > { %v3227_v61 = vpop.f32.mrf.mxu1 }
 0x27c   : > { %v1283_v14 = vmax.f32 %v3225_v30, %v3227_v61 }
 0x27e   : > { %1284 = vmax.xlane.f32.xlu1 %v1283_v14 }
 0x282   : > { %v3231_v62 = vpop.f32.mrf.mxu0 }
 0x283   : > { %v3233_v63 = vpop.f32.mrf.mxu1 }
 0x284   : > { %v1286_v0 = vmax.f32 %v3231_v62, %v3233_v63 }
 0x286   : > { %1287 = vmax.xlane.f32.xlu2 %v1286_v0 }
 0x28a   : > { %v3237_v1 = vpop.f32.mrf.mxu0 }
 0x28b   : > { %v3239_v2 = vpop.f32.mrf.mxu1 }
 0x28c   : > { %v1289_v3 = vmax.f32 %v3237_v1, %v3239_v2 }
 0x28e   : > { %1290 = vmax.xlane.f32.xlu2 %v1289_v3 }
 0x292   : > { %v3243_v5 = vpop.f32.mrf.mxu0 }
 0x293   : > { %v3245_v6 = vpop.f32.mrf.mxu1 }
 0x294   : > { %v1292_v9 = vmax.f32 %v3243_v5, %v3245_v6 }
 0x296   : > { %1293 = vmax.xlane.f32.xlu0 %v1292_v9 }
 0x29a   : > { %v3249_v10 = vpop.f32.mrf.mxu0 }
 0x29b   : > { %v3251_v39 = vpop.f32.mrf.mxu1 }
 0x29c   : > { %v1295_v26 = vmax.f32 %v3249_v10, %v3251_v39 }
 0x29e   : > { %1296 = vmax.xlane.f32.xlu1 %v1295_v26 }
 0x2a2   : > { %v3255_v11 = vpop.f32.mrf.mxu0 }
 0x2a3   : > { %v3257_v12 = vpop.f32.mrf.mxu1 }
 0x2a4   : > { %v1298_v13 = vmax.f32 %v3255_v11, %v3257_v12 }
 0x2a6   : > { %1299 = vmax.xlane.f32.xlu1 %v1298_v13 }
 0x2aa   : > { %v3261_v19 = vpop.f32.mrf.mxu0 }
 0x2ab   : > { %v3263_v20 = vpop.f32.mrf.mxu1 }
 0x2ac   : > { %v1301_v42 = vmax.f32 %v3261_v19, %v3263_v20 }
 0x2b2   : > { %v3271_v32 = vpop.f32.mrf.mxu0 }
 0x2b3   : > { %v3273_v34 = vpop.f32.mrf.mxu1 }
 0x2ba   : > { %v3285_v21 = vpop.f32.mrf.mxu0 }
 0x2bb   : > { %v3287_v46 = vpop.f32.mrf.mxu1 }
 0x2c3   : > { %v3305_v60 = vpop.f32.mrf.mxu1 }
 0x2d9   : > { %v1276_v7 = vpop.xlane.xlu0 %1275 }
 0x2da   : > { %v1322_v15 = vsub.f32 %v1185_v50, %v1276_v7  ;;  %v1323_v8 = vsub.f32 %v1234_v4, %v1276_v7  ;;  %v1304_v50 = vmax.f32 %v3271_v32, %v3273_v34 }
 0x2dc   : > { %v1354_v17 = vmul.f32 1.442695, %v1322_v15  ;;  %v1356_v18 = vmul.f32 1.442695, %v1323_v8  ;;  %v3323_v8 = vpop.f32.mrf.mxu1 }
 0x2de   : > { %2533 = vpow2.f32 %v1354_v17  ;;  %v2260_v17 = vld [vmem:[#allocation2 + $0x170] sm:$0xf] }
 0x2df   : > { %2535 = vpow2.f32 %v1356_v18 }
 0x2e1   : > { %v1279_v23 = vpop.xlane.xlu0 %1278 }
 0x2e2   : > { %v1324_v49 = vsub.f32 %v1187_v52, %v1279_v23  ;;  %v1325_v16 = vsub.f32 %v1236_v53, %v1279_v23 }
 0x2e4   : > { %v3265_v24 = vpop.eup %2533  ;;  %v1358_v25 = vmul.f32 1.442695, %v1324_v49  ;;  %v1360_v27 = vmul.f32 1.442695, %v1325_v16  ;;  %v2350_v49 = vld [vmem:[#allocation2 + $0x178] sm:$0xf0] }
 0x2e5   : > { %v3267_v28 = vpop.eup %2535  ;;  %v2224_v16 = vld [vmem:[#allocation2 + $0x98] sm:$0xf] }
 0x2e6   : > { %2537 = vpow2.f32 %v1358_v25  ;;  %v1418_v31 = vadd.f32 %v3267_v28, %v3265_v24  ;;  %v2341_v25 = vld [vmem:[#allocation2 + $0xa0] sm:$0xf0] }
 0x2e7   : > { %2539 = vpow2.f32 %v1360_v27 }
 0x2e8   : > { %1419 = vadd.xlane.f32.xlu2 %v1418_v31 }
 0x2e9   : > { %v1282_v33 = vpop.xlane.xlu1 %1281 }
 0x2ea   : > { %v1326_v35 = vsub.f32 %v1190_v57, %v1282_v33  ;;  %v1327_v36 = vsub.f32 %v1239_v59, %v1282_v33  ;;  %v3301_v57 = vpop.f32.mrf.mxu0  ;;  %v2261_v33 = vor.u32 %v2350_v49, %v2260_v17 }
 0x2eb   : > { %v1310_v26 = vmax.f32 %v3301_v57, %v3305_v60 }
 0x2ec   : > { %v3275_v37 = vpop.eup %2537  ;;  %v1362_v58 = vmul.f32 1.442695, %v1326_v35  ;;  %v1364_v38 = vmul.f32 1.442695, %v1327_v36  ;;  %v2256_v35 = vld [vmem:[#allocation2 + $0x158] sm:$0xf]  ;;  %1675 = vmatpush.bf16.msra.mxu3 %v2261_v33 }
 0x2ed   : > { %v3277_v40 = vpop.eup %2539  ;;  %v2349_v36 = vld [vmem:[#allocation2 + $0x160] sm:$0xf0]  ;;  %v2248_v33 = vld [vmem:[#allocation2 + $0x128] sm:$0xf] }
 0x2ee   : > { %2541 = vpow2.f32 %v1362_v58  ;;  %v1421_v41 = vadd.f32 %v3277_v40, %v3275_v37  ;;  %v2225_v58 = vor.u32 %v2341_v25, %v2224_v16 }
 0x2ef   : > { %2543 = vpow2.f32 %v1364_v38  ;;  %v2220_v38 = vld [vmem:[#allocation2 + $0x80] sm:$0xf] }
 0x2f0   : > { %1422 = vadd.xlane.f32.xlu0 %v1421_v41  ;;  %1302 = vmax.xlane.f32.xlu2 %v1301_v42 }
 0x2f1   : > { %v1285_v43 = vpop.xlane.xlu1 %1284 }
 0x2f2   : > { %v1328_v44 = vsub.f32 %v3225_v30, %v1285_v43  ;;  %v1329_v45 = vsub.f32 %v3227_v61, %v1285_v43  ;;  %v1307_v61 = vmax.f32 %v3285_v21, %v3287_v46  ;;  %v3319_v7 = vpop.f32.mrf.mxu0 }
 0x2f4   : > { %v3289_v47 = vpop.eup %2541  ;;  %v1366_v48 = vmul.f32 1.442695, %v1328_v44  ;;  %v1368_v22 = vmul.f32 1.442695, %v1329_v45  ;;  %v2340_v44 = vld [vmem:[#allocation2 + $0x88] sm:$0xf0] }
 0x2f5   : > { %v3293_v4 = vpop.eup %2543 }
 0x2f6   : > { %2545 = vpow2.f32 %v1366_v48  ;;  %v1424_v51 = vadd.f32 %v3293_v4, %v3289_v47  ;;  %v2257_v48 = vor.u32 %v2349_v36, %v2256_v35  ;;  %v2347_v36 = vld [vmem:[#allocation2 + $0x130] sm:$0xf0] }
 0x2f7   : > { %2547 = vpow2.f32 %v1368_v22  ;;  %v2252_v22 = vld [vmem:[#allocation2 + $0x140] sm:$0xf] }
 0x2f8   : > { %1425 = vadd.xlane.f32.xlu0 %v1424_v51  ;;  %1305 = vmax.xlane.f32.xlu2 %v1304_v50  ;;  %v2348_v50 = vld [vmem:[#allocation2 + $0x148] sm:$0xf0]  ;;  %v2221_v51 = vor.u32 %v2340_v44, %v2220_v38  ;;  %v2212_v38 = vld [vmem:[#allocation2 + $0x50] sm:$0xf] }
 0x2f9   : > { %v1288_v52 = vpop.xlane.xlu2 %1287  ;;  %1676 = vmatpush.bf16.msra.mxu3 %v2257_v48  ;;  %v2346_v48 = vld [vmem:[#allocation2 + $0x118] sm:$0xf0] }
 0x2fa   : > { %v1330_v53 = vsub.f32 %v3231_v62, %v1288_v52  ;;  %v1331_v54 = vsub.f32 %v3233_v63, %v1288_v52  ;;  %v3335_v52 = vpop.f32.mrf.mxu0 }
 0x2fc   : > { %v3299_v55 = vpop.eup %2545  ;;  %v1370_v29 = vmul.f32 1.442695, %v1330_v53  ;;  %v1372_v56 = vmul.f32 1.442695, %v1331_v54  ;;  %v3337_v53 = vpop.f32.mrf.mxu1 }
 0x2fd   : > { %v3303_v59 = vpop.eup %2547 }
 0x2fe   : > { %2549 = vpow2.f32 %v1370_v29  ;;  %v1427_v30 = vadd.f32 %v3303_v59, %v3299_v55  ;;  %v2253_v29 = vor.u32 %v2348_v50, %v2252_v22  ;;  %v2337_v22 = vld [vmem:[#allocation2 + $0x40] sm:$0xf0]  ;;  %v2240_v50 = vld [vmem:[#allocation2 + $0xf8] sm:$0xf] }
 0x2ff   : > { %2551 = vpow2.f32 %v1372_v56 }
 0x300   : > { %1428 = vadd.xlane.f32.xlu1 %v1427_v30  ;;  %1308 = vmax.xlane.f32.xlu0 %v1307_v61 }
 0x301   : > { %v1291_v14 = vpop.xlane.xlu2 %1290  ;;  %1677 = vmatpush.bf16.msra.mxu3 %v2253_v29 }
 0x302   : > { %v1332_v62 = vsub.f32 %v3237_v1, %v1291_v14  ;;  %v1333_v63 = vsub.f32 %v3239_v2, %v1291_v14  ;;  %v2228_v1 = vld [vmem:[#allocation2 + $0xb0] sm:$0xf]  ;;  %v2342_v2 = vld [vmem:[#allocation2 + $0xb8] sm:$0xf0] }
 0x303   : > { %v2229_v23 = vor.u32 %v2342_v2, %v2228_v1 }
 0x304   : > { %v3313_v0 = vpop.eup %2549  ;;  %v1374_v3 = vmul.f32 1.442695, %v1332_v62  ;;  %v1376_v9 = vmul.f32 1.442695, %v1333_v63  ;;  %v1316_v63 = vmax.f32 %v3335_v52, %v3337_v53  ;;  %v3353_v1 = vpop.f32.mrf.mxu1 }
 0x305   : > { %v3317_v13 = vpop.eup %2551  ;;  %1626 = vmatpush.bf16.msra.mxu2 %v2229_v23 }
 0x306   : > { %2553 = vpow2.f32 %v1374_v3  ;;  %v1430_v15 = vadd.f32 %v3317_v13, %v3313_v0 }
 0x307   : > { %2555 = vpow2.f32 %v1376_v9 }
 0x308   : > { %1431 = vadd.xlane.f32.xlu1 %v1430_v15  ;;  %1311 = vmax.xlane.f32.xlu0 %v1310_v26  ;;  %v3351_v15 = vpop.f32.mrf.mxu0 }
 0x309   : > { %v1294_v18 = vpop.xlane.xlu0 %1293  ;;  %1627 = vmatpush.bf16.msra.mxu2 %v2225_v58  ;;  %v1319_v49 = vmax.f32 %v3351_v15, %v3353_v1  ;;  %v2249_v58 = vor.u32 %v2347_v36, %v2248_v33 }
 0x30a   : > { %v1334_v27 = vsub.f32 %v3243_v5, %v1294_v18  ;;  %v1335_v31 = vsub.f32 %v3245_v6, %v1294_v18  ;;  %v1313_v6 = vmax.f32 %v3319_v7, %v3323_v8 }
 0x30b   : > { %1678 = vmatpush.bf16.msra.mxu3 %v2249_v58 }
 0x30c   : > { %v3327_v41 = vpop.eup %2553  ;;  %v1378_v42 = vmul.f32 1.442695, %v1334_v27  ;;  %v1380_v43 = vmul.f32 1.442695, %v1335_v31  ;;  %v2216_v27 = vld [vmem:[#allocation2 + $0x68] sm:$0xf] }
 0x30d   : > { %v3329_v45 = vpop.eup %2555  ;;  %1628 = vmatpush.bf16.msra.mxu2 %v2221_v51  ;;  %v2339_v31 = vld [vmem:[#allocation2 + $0x70] sm:$0xf0] }
 0x30e   : > { %2557 = vpow2.f32 %v1378_v42  ;;  %v1433_v5 = vadd.f32 %v3329_v45, %v3327_v41  ;;  %v2217_v35 = vor.u32 %v2339_v31, %v2216_v27  ;;  %v2338_v42 = vld [vmem:[#allocation2 + $0x58] sm:$0xf0] }
 0x30f   : > { %2559 = vpow2.f32 %v1380_v43  ;;  %v2244_v43 = vld [vmem:[#allocation2 + $0x110] sm:$0xf]  ;;  %v2213_v44 = vor.u32 %v2338_v42, %v2212_v38 }
 0x310   : > { %1434 = vadd.xlane.f32.xlu2 %v1433_v5  ;;  %1314 = vmax.xlane.f32.xlu1 %v1313_v6  ;;  %v2245_v5 = vor.u32 %v2346_v48, %v2244_v43  ;;  %v2208_v6 = vld [vmem:[#allocation2 + $0x38] sm:$0xf] }
 0x311   : > { %v1297_v54 = vpop.xlane.xlu1 %1296  ;;  %1629 = vmatpush.bf16.msra.mxu2 %v2217_v35  ;;  %v2209_v51 = vor.u32 %v2337_v22, %v2208_v6 }
 0x312   : > { %v1336_v56 = vsub.f32 %v3249_v10, %v1297_v54  ;;  %v1337_v30 = vsub.f32 %v3251_v39, %v1297_v54  ;;  %1679 = vmatpush.bf16.msra.mxu3 %v2245_v5  ;;  %v2345_v54 = vld [vmem:[#allocation2 + $0x100] sm:$0xf0] }
 0x313   : > { %v2241_v29 = vor.u32 %v2345_v54, %v2240_v50 }
 0x314   : > { %v3341_v61 = vpop.eup %2557  ;;  %v1382_v14 = vmul.f32 1.442695, %v1336_v56  ;;  %v1384_v62 = vmul.f32 1.442695, %v1337_v30  ;;  %v2204_v56 = vld [vmem:[#allocation2 + $0x20] sm:$0xf] }
 0x315   : > { %v3345_v3 = vpop.eup %2559  ;;  %1630 = vmatpush.bf16.msra.mxu2 %v2213_v44  ;;  %v2336_v30 = vld [vmem:[#allocation2 + $0x28] sm:$0xf0] }
 0x316   : > { %2561 = vpow2.f32 %v1382_v14  ;;  %v1436_v9 = vadd.f32 %v3345_v3, %v3341_v61  ;;  %1680 = vmatpush.bf16.msra.mxu3 %v2241_v29  ;;  %v2236_v14 = vld [vmem:[#allocation2 + $0xe0] sm:$0xf] }
 0x317   : > { %2563 = vpow2.f32 %v1384_v62  ;;  %v2205_v62 = vor.u32 %v2336_v30, %v2204_v56 }
 0x318   : > { %1437 = vadd.xlane.f32.xlu2 %v1436_v9  ;;  %1317 = vmax.xlane.f32.xlu1 %v1316_v63  ;;  %v2344_v63 = vld [vmem:[#allocation2 + $0xe8] sm:$0xf0] }
 0x319   : > { %v1300_v10 = vpop.xlane.xlu1 %1299  ;;  %1631 = vmatpush.bf16.msra.mxu2 %v2209_v51  ;;  %v2237_v9 = vor.u32 %v2344_v63, %v2236_v14 }
 0x31a   : > { %v1338_v39 = vsub.f32 %v3255_v11, %v1300_v10  ;;  %v1339_v26 = vsub.f32 %v3257_v12, %v1300_v10  ;;  %v2200_v10 = vld [vmem:[#allocation2 + $0x8] sm:$0xf] }
 0x31b   : > { %1681 = vmatpush.bf16.msra.mxu3 %v2237_v9 }
 0x31c   : > { %v3355_v2 = vpop.eup %2561  ;;  %v1386_v17 = vmul.f32 1.442695, %v1338_v39  ;;  %v1388_v18 = vmul.f32 1.442695, %v1339_v26  ;;  %v2335_v39 = vld [vmem:[#allocation2 + $0x10] sm:$0xf0] }
 0x31d   : > { %v3357_v23 = vpop.eup %2563  ;;  %1632 = vmatpush.bf16.msra.mxu2 %v2205_v62  ;;  %v2232_v26 = vld [vmem:[#allocation2 + $0xc8] sm:$0xf] }
 0x31e   : > { %2565 = vpow2.f32 %v1386_v17  ;;  %v1439_v16 = vadd.f32 %v3357_v23, %v3355_v2  ;;  %v2201_v17 = vor.u32 %v2335_v39, %v2200_v10 }
 0x31f   : > { %2567 = vpow2.f32 %v1388_v18  ;;  %v2343_v18 = vld [vmem:[#allocation2 + $0xd0] sm:$0xf0] }
 0x320   : > { %1440 = vadd.xlane.f32.xlu0 %v1439_v16  ;;  %1320 = vmax.xlane.f32.xlu2 %v1319_v49  ;;  %v2233_v49 = vor.u32 %v2343_v18, %v2232_v26 }
 0x321   : > { %1633 = vmatpush.bf16.msra.mxu2 %v2201_v17 }
 0x322   : > { %1682 = vmatpush.bf16.msra.mxu3 %v2233_v49 }
 0x324   : > { %v3363_v11 = vpop.eup %2565 }
 0x325   : > { %v3365_v12 = vpop.eup %2567 }
 0x326   : > { %v1442_v25 = vadd.f32 %v3365_v12, %v3363_v11 }
 0x328   : > { %1443 = vadd.xlane.f32.xlu0 %v1442_v25 }
 0x35b   : > { %v1420_v16 = vpop.xlane.xlu2 %1419 }
 0x35c   : > { %2569 = vrcp.f32 %v1420_v16 }
 0x362   : > { %v2570_v58 = vpop.eup %2569 }
 0x363   : > { %v1423_v25 = vpop.xlane.xlu0 %1422  ;;  %v1303_v27 = vpop.xlane.xlu2 %1302  ;;  %v1482_v44 = vmul.f32 %v2570_v58, %v3265_v24  ;;  %v1483_v5 = vmul.f32 %v2570_v58, %v3267_v28 }
 0x364   : > { %2571 = vrcp.f32 %v1423_v25  ;;  %v1340_v31 = vsub.f32 %v3261_v19, %v1303_v27  ;;  %v1341_v33 = vsub.f32 %v3263_v20, %v1303_v27 }
 0x366   : > { %v1390_v35 = vmul.f32 1.442695, %v1340_v31  ;;  %v1392_v36 = vmul.f32 1.442695, %v1341_v33 }
 0x368   : > { %2573 = vpow2.f32 %v1390_v35 }
 0x369   : > { %2575 = vpow2.f32 %v1392_v36 }
 0x36a   : > { %v2572_v38 = vpop.eup %2571 }
 0x36b   : > { %v1426_v42 = vpop.xlane.xlu0 %1425  ;;  %v1306_v43 = vpop.xlane.xlu2 %1305  ;;  %v1484_v48 = vmul.f32 %v2572_v38, %v3275_v37  ;;  %v1485_v6 = vmul.f32 %v2572_v38, %v3277_v40 }
 0x36c   : > { %v1342_v19 = vsub.f32 %v3271_v32, %v1306_v43  ;;  %v1343_v20 = vsub.f32 %v3273_v34, %v1306_v43 }
 0x36d   : > { %v1514_v22 = vpack.c.bf16 %v1484_v48, %v1482_v44  ;;  %v1515_v50 = vpack.c.bf16 %v1485_v6, %v1483_v5 }
 0x36e   : > { %v3377_v51 = vpop.eup %2573  ;;  %v1394_v54 = vmul.f32 1.442695, %v1342_v19  ;;  %v1396_v29 = vmul.f32 1.442695, %v1343_v20 }
 0x36f   : > { %v3379_v56 = vpop.eup %2575  ;;  %1634 = vmatmul.bf16.vlgmr.msra.gmra.mxu2 %v1514_v22  ;;  %1683 = vmatmul.bf16.vlgmr.msra.gmra.mxu3 %v1515_v50 }
 0x370   : > { %2577 = vpow2.f32 %v1394_v54  ;;  %v1445_v24 = vadd.f32 %v3379_v56, %v3377_v51 }
 0x371   : > { %2579 = vpow2.f32 %v1396_v29 }
 0x372   : > { %2581 = vrcp.f32 %v1426_v42  ;;  %1446 = vadd.xlane.f32.xlu1 %v1445_v24 }
 0x373   : > { %v1429_v28 = vpop.xlane.xlu1 %1428  ;;  %v1309_v32 = vpop.xlane.xlu0 %1308 }
 0x374   : > { %2583 = vrcp.f32 %v1429_v28  ;;  %v1344_v34 = vsub.f32 %v3285_v21, %v1309_v32  ;;  %v1345_v37 = vsub.f32 %v3287_v46, %v1309_v32 }
 0x376   : > { %v3385_v40 = vpop.eup %2577  ;;  %v1398_v30 = vmul.f32 1.442695, %v1344_v34  ;;  %v1400_v14 = vmul.f32 1.442695, %v1345_v37 }
 0x377   : > { %v3387_v62 = vpop.eup %2579 }
 0x378   : > { %v2582_v63 = vpop.eup %2581  ;;  %2585 = vpow2.f32 %v1398_v30  ;;  %v1448_v9 = vadd.f32 %v3387_v62, %v3385_v40 }
 0x379   : > { %2587 = vpow2.f32 %v1400_v14  ;;  %v1486_v21 = vmul.f32 %v2582_v63, %v3289_v47  ;;  %v1487_v17 = vmul.f32 %v2582_v63, %v3293_v4 }
 0x37a   : > { %v2584_v10 = vpop.eup %2583  ;;  %1449 = vadd.xlane.f32.xlu2 %v1448_v9 }
 0x37b   : > { %v1432_v39 = vpop.xlane.xlu1 %1431  ;;  %v1312_v26 = vpop.xlane.xlu0 %1311  ;;  %v1488_v46 = vmul.f32 %v2584_v10, %v3299_v55  ;;  %v1489_v18 = vmul.f32 %v2584_v10, %v3303_v59 }
 0x37c   : > { %v1346_v49 = vsub.f32 %v3301_v57, %v1312_v26  ;;  %v1347_v16 = vsub.f32 %v3305_v60, %v1312_v26 }
 0x37d   : > { %v1516_v25 = vpack.c.bf16 %v1488_v46, %v1486_v21  ;;  %v1517_v27 = vpack.c.bf16 %v1489_v18, %v1487_v17 }
 0x37e   : > { %v3397_v31 = vpop.eup %2585  ;;  %v1402_v33 = vmul.f32 1.442695, %v1346_v49  ;;  %v1404_v35 = vmul.f32 1.442695, %v1347_v16 }
 0x37f   : > { %v3399_v36 = vpop.eup %2587  ;;  %1639 = vmatmul.bf16.gmra.mxu2 %v1516_v25  ;;  %1688 = vmatmul.bf16.gmra.mxu3 %v1517_v27 }
 0x380   : > { %2589 = vpow2.f32 %v1402_v33  ;;  %v1451_v47 = vadd.f32 %v3399_v36, %v3397_v31 }
 0x381   : > { %2591 = vpow2.f32 %v1404_v35 }
 0x382   : > { %2593 = vrcp.f32 %v1432_v39  ;;  %1452 = vadd.xlane.f32.xlu0 %v1451_v47 }
 0x383   : > { %v1435_v4 = vpop.xlane.xlu2 %1434  ;;  %v1315_v55 = vpop.xlane.xlu1 %1314 }
 0x384   : > { %2595 = vrcp.f32 %v1435_v4  ;;  %v1348_v57 = vsub.f32 %v3319_v7, %v1315_v55  ;;  %v1349_v59 = vsub.f32 %v3323_v8, %v1315_v55  ;;  %v2352_v55 = vld [vmem:[%s3447_s12] sm:$0xff]  }
 0x386   : > { %v3405_v60 = vpop.eup %2589  ;;  %v1406_v58 = vmul.f32 1.442695, %v1348_v57  ;;  %v1408_v38 = vmul.f32 1.442695, %v1349_v59 }
 0x387   : > { %v3407_v42 = vpop.eup %2591 }
 0x388   : > { %v2594_v43 = vpop.eup %2593  ;;  %2597 = vpow2.f32 %v1406_v58  ;;  %v1454_v44 = vadd.f32 %v3407_v42, %v3405_v60  ;;  %v3450_v58 = vstv %s1758_s10 }
 0x389   : > { %2599 = vpow2.f32 %v1408_v38  ;;  %v1490_v7 = vmul.f32 %v2594_v43, %v3313_v0  ;;  %v1491_v19 = vmul.f32 %v2594_v43, %v3317_v13 }
 0x38a   : > { %v2596_v48 = vpop.eup %2595  ;;  %1455 = vadd.xlane.f32.xlu1 %v1454_v44 }
 0x38b   : > { %v1438_v5 = vpop.xlane.xlu2 %1437  ;;  %v1318_v6 = vpop.xlane.xlu1 %1317  ;;  %v1492_v8 = vmul.f32 %v2596_v48, %v3327_v41  ;;  %v1493_v20 = vmul.f32 %v2596_v48, %v3329_v45 }
 0x38c   : > { %v1350_v22 = vsub.f32 %v3335_v52, %v1318_v6  ;;  %v1351_v50 = vsub.f32 %v3337_v53, %v1318_v6  ;;  %v2354_v6 = vunpack.c.h.bf16 %v2352_v55 }
 0x38d   : > { %v1518_v54 = vpack.c.bf16 %v1492_v8, %v1490_v7  ;;  %v1519_v29 = vpack.c.bf16 %v1493_v20, %v1491_v19 }
 0x38e   : > { %v3417_v24 = vpop.eup %2597  ;;  %v1410_v28 = vmul.f32 1.442695, %v1350_v22  ;;  %v1412_v32 = vmul.f32 1.442695, %v1351_v50 }
 0x38f   : > { %v3419_v34 = vpop.eup %2599  ;;  %1644 = vmatmul.bf16.gmra.mxu2 %v1518_v54  ;;  %1693 = vmatmul.bf16.gmra.mxu3 %v1519_v29 }
 0x390   : > { %2601 = vpow2.f32 %v1410_v28  ;;  %v1457_v0 = vadd.f32 %v3419_v34, %v3417_v24 }
 0x391   : > { %2603 = vpow2.f32 %v1412_v32 }
 0x392   : > { %2605 = vrcp.f32 %v1438_v5  ;;  %1458 = vadd.xlane.f32.xlu2 %v1457_v0  ;;  %v2383_v0 = vld [vmem:[%s3447_s12 + $0x8] sm:$0xff]  }
 0x393   : > { %v1441_v13 = vpop.xlane.xlu0 %1440  ;;  %v1321_v41 = vpop.xlane.xlu2 %1320 }
 0x394   : > { %2607 = vrcp.f32 %v1441_v13  ;;  %v1352_v45 = vsub.f32 %v3351_v15, %v1321_v41  ;;  %v1353_v52 = vsub.f32 %v3353_v1, %v1321_v41 }
 0x396   : > { %v3425_v53 = vpop.eup %2601  ;;  %v1414_v37 = vmul.f32 1.442695, %v1352_v45  ;;  %v1416_v30 = vmul.f32 1.442695, %v1353_v52  ;;  %v2357_v45 = vunpack.c.l.bf16 %v2383_v0 }
 0x397   : > { %v3427_v14 = vpop.eup %2603 }
 0x398   : > { %v2606_v63 = vpop.eup %2605  ;;  %2609 = vpow2.f32 %v1414_v37  ;;  %v1460_v9 = vadd.f32 %v3427_v14, %v3425_v53 }
 0x399   : > { %2611 = vpow2.f32 %v1416_v30  ;;  %v1494_v39 = vmul.f32 %v2606_v63, %v3341_v61  ;;  %v1495_v1 = vmul.f32 %v2606_v63, %v3345_v3 }
 0x39a   : > { %v2608_v10 = vpop.eup %2607  ;;  %1461 = vadd.xlane.f32.xlu0 %v1460_v9  ;;  %v2358_v9 = vunpack.c.h.bf16 %v2383_v0 }
 0x39b   : > { %v1496_v15 = vmul.f32 %v2608_v10, %v3355_v2  ;;  %v1497_v26 = vmul.f32 %v2608_v10, %v3357_v23  ;;  %v1444_v61 = vpop.xlane.xlu0 %1443 }
 0x39c   : > { %2613 = vrcp.f32 %v1444_v61 }
 0x39d   : > { %v1520_v21 = vpack.c.bf16 %v1496_v15, %v1494_v39  ;;  %v1521_v46 = vpack.c.bf16 %v1497_v26, %v1495_v1 }
 0x39e   : > { %v3435_v17 = vpop.eup %2609 }
 0x39f   : > { %v3437_v18 = vpop.eup %2611  ;;  %1649 = vmatmul.bf16.gmra.mxu2 %v1520_v21  ;;  %1698 = vmatmul.bf16.gmra.mxu3 %v1521_v46 }
 0x3a0   : > { %v1463_v49 = vadd.f32 %v3437_v18, %v3435_v17 }
 0x3a2   : > { %1464 = vadd.xlane.f32.xlu1 %v1463_v49  ;;  %v2614_v3 = vpop.eup %2613 }
 0x3a3   : > { %v1498_v16 = vmul.f32 %v2614_v3, %v3363_v11  ;;  %v1499_v27 = vmul.f32 %v2614_v3, %v3365_v12  ;;  %v2384_v3 = vld [vmem:[%s3447_s12 + $0x10] sm:$0xff]  }
 0x3e5   : > { %v1447_v2 = vpop.xlane.xlu1 %1446 }
 0x3e6   : > { %2615 = vrcp.f32 %v1447_v2 }
 0x3ec   : > { %v2616_v23 = vpop.eup %2615 }
 0x3ed   : > { %v1500_v25 = vmul.f32 %v2616_v23, %v3377_v51  ;;  %v1501_v33 = vmul.f32 %v2616_v23, %v3379_v56  ;;  %v1450_v4 = vpop.xlane.xlu2 %1449  ;;  %v2353_v51 = vunpack.c.l.bf16 %v2352_v55 }
 0x3ee   : > { %2617 = vrcp.f32 %v1450_v4  ;;  %v2362_v4 = vunpack.c.h.bf16 %v2384_v3 }
 0x3ef   : > { %v1522_v35 = vpack.c.bf16 %v1500_v25, %v1498_v16  ;;  %v1523_v47 = vpack.c.bf16 %v1501_v33, %v1499_v27  ;;  %v2361_v25 = vunpack.c.l.bf16 %v2384_v3 }
 0x3f1   : > { %1654 = vmatmul.bf16.gmra.mxu2 %v1522_v35  ;;  %1703 = vmatmul.bf16.gmra.mxu3 %v1523_v47 }
 0x3f2   : > { %v1635_v57 = vpop.f32.mrf.mxu2  ;;  %v1684_v59 = vpop.f32.mrf.mxu3 }
 0x3f3   : > { %v1685_v11 = vadd.f32 %v1684_v59, %v1635_v57 }
 0x3f4   : > { %v2618_v43 = vpop.eup %2617 }
 0x3f5   : > { %v1760_v12 = vmul.f32 %v3450_v58, %v1685_v11  ;;  %v1453_v56 = vpop.xlane.xlu0 %1452  ;;  %v1502_v8 = vmul.f32 %v2618_v43, %v3385_v40  ;;  %v1503_v22 = vmul.f32 %v2618_v43, %v3387_v62 }
 0x3f6   : > { %2619 = vrcp.f32 %v1453_v56 }
 0x3f7   : > { %v1776_v38 = vadd.f32 %v2353_v51, %v1760_v12 }
 0x3f9   : > { %1792 = vst [vmem:[%s2995_s5] sm:$0xff] %v1776_v38 }
 0x3fa   : > { %v1637_v44 = vpop.f32.mrf.mxu2  ;;  %v1686_v48 = vpop.f32.mrf.mxu3 }
 0x3fb   : > { %v1687_v5 = vadd.f32 %v1686_v48, %v1637_v44  ;;  %v2385_v44 = vld [vmem:[%s3447_s12 + $0x18] sm:$0xff]  }
 0x3fc   : > { %v2620_v7 = vpop.eup %2619 }
 0x3fd   : > { %v1761_v19 = vmul.f32 %v3450_v58, %v1687_v5  ;;  %v1504_v20 = vmul.f32 %v2620_v7, %v3397_v31  ;;  %v1505_v50 = vmul.f32 %v2620_v7, %v3399_v36  ;;  %v1456_v32 = vpop.xlane.xlu1 %1455 }
 0x3fe   : > { %2621 = vrcp.f32 %v1456_v32 }
 0x3ff   : > { %v1777_v54 = vadd.f32 %v2354_v6, %v1761_v19  ;;  %v1524_v29 = vpack.c.bf16 %v1504_v20, %v1502_v8  ;;  %v1525_v28 = vpack.c.bf16 %v1505_v50, %v1503_v22  ;;  %v2365_v6 = vunpack.c.l.bf16 %v2385_v44  ;;  %v2386_v50 = vld [vmem:[%s3447_s12 + $0x20] sm:$0xff]  }
 0x400   : > { %v2366_v19 = vunpack.c.h.bf16 %v2385_v44  ;;  %v2369_v32 = vunpack.c.l.bf16 %v2386_v50 }
 0x401   : > { %1793 = vst [vmem:[%s2995_s5 + $0x8] sm:$0xff] %v1777_v54  ;;  %1659 = vmatmul.bf16.gmra.mxu2 %v1524_v29  ;;  %1708 = vmatmul.bf16.gmra.mxu3 %v1525_v28 }
 0x402   : > { %v1640_v13 = vpop.f32.mrf.mxu2  ;;  %v1689_v41 = vpop.f32.mrf.mxu3 }
 0x403   : > { %v1690_v40 = vadd.f32 %v1689_v41, %v1640_v13 }
 0x404   : > { %v2622_v36 = vpop.eup %2621 }
 0x405   : > { %v1762_v31 = vmul.f32 %v3450_v58, %v1690_v40  ;;  %v1459_v52 = vpop.xlane.xlu2 %1458  ;;  %v1506_v39 = vmul.f32 %v2622_v36, %v3405_v60  ;;  %v1507_v26 = vmul.f32 %v2622_v36, %v3407_v42  ;;  %v2387_v36 = vld [vmem:[%s3447_s12 + $0x28] sm:$0xff]  }
 0x406   : > { %2623 = vrcp.f32 %v1459_v52 }
 0x407   : > { %v1778_v62 = vadd.f32 %v2357_v45, %v1762_v31  ;;  %v2370_v31 = vunpack.c.h.bf16 %v2386_v50 }
 0x409   : > { %1794 = vst [vmem:[%s2995_s5 + $0x10] sm:$0xff] %v1778_v62 }
 0x40a   : > { %v1642_v37 = vpop.f32.mrf.mxu2  ;;  %v1691_v30 = vpop.f32.mrf.mxu3 }
 0x40b   : > { %v1692_v63 = vadd.f32 %v1691_v30, %v1642_v37 }
 0x40c   : > { %v2624_v10 = vpop.eup %2623 }
 0x40d   : > { %v1763_v15 = vmul.f32 %v3450_v58, %v1692_v63  ;;  %v1508_v1 = vmul.f32 %v2624_v10, %v3417_v24  ;;  %v1509_v21 = vmul.f32 %v2624_v10, %v3419_v34  ;;  %v1462_v2 = vpop.xlane.xlu0 %1461 }
 0x40e   : > { %2625 = vrcp.f32 %v1462_v2 }
 0x40f   : > { %v1779_v46 = vadd.f32 %v2358_v9, %v1763_v15  ;;  %v1526_v49 = vpack.c.bf16 %v1508_v1, %v1506_v39  ;;  %v1527_v61 = vpack.c.bf16 %v1509_v21, %v1507_v26  ;;  %v2373_v9 = vunpack.c.l.bf16 %v2387_v36 }
 0x410   : > { %v2374_v21 = vunpack.c.h.bf16 %v2387_v36 }
 0x411   : > { %1795 = vst [vmem:[%s2995_s5 + $0x18] sm:$0xff] %v1779_v46  ;;  %1664 = vmatmul.bf16.gmra.mxu2 %v1526_v49  ;;  %1713 = vmatmul.bf16.gmra.mxu3 %v1527_v61  ;;  %v2388_v61 = vld [vmem:[%s3447_s12 + $0x30] sm:$0xff]  }
 0x412   : > { %v1645_v23 = vpop.f32.mrf.mxu2  ;;  %v1694_v16 = vpop.f32.mrf.mxu3 }
 0x413   : > { %v1695_v60 = vadd.f32 %v1694_v16, %v1645_v23  ;;  %v2377_v16 = vunpack.c.l.bf16 %v2388_v61 }
 0x414   : > { %v2626_v34 = vpop.eup %2625 }
 0x415   : > { %v1764_v24 = vmul.f32 %v3450_v58, %v1695_v60  ;;  %v1465_v27 = vpop.xlane.xlu1 %1464  ;;  %v1510_v57 = vmul.f32 %v2626_v34, %v3425_v53  ;;  %v1511_v51 = vmul.f32 %v2626_v34, %v3427_v14  ;;  %v2378_v34 = vunpack.c.h.bf16 %v2388_v61 }
 0x416   : > { %2627 = vrcp.f32 %v1465_v27 }
 0x417   : > { %v1780_v42 = vadd.f32 %v2361_v25, %v1764_v24 }
 0x419   : > { %1796 = vst [vmem:[%s2995_s5 + $0x20] sm:$0xff] %v1780_v42 }
 0x41a   : > { %v1647_v33 = vpop.f32.mrf.mxu2  ;;  %v1696_v35 = vpop.f32.mrf.mxu3 }
 0x41b   : > { %v1697_v47 = vadd.f32 %v1696_v35, %v1647_v33 }
 0x41c   : > { %v2628_v55 = vpop.eup %2627 }
 0x41d   : > { %v1765_v59 = vmul.f32 %v3450_v58, %v1697_v47  ;;  %v1512_v11 = vmul.f32 %v2628_v55, %v3435_v17  ;;  %v1513_v12 = vmul.f32 %v2628_v55, %v3437_v18  ;;  %v2389_v47 = vld [vmem:[%s3447_s12 + $0x38] sm:$0xff]  }
 0x41f   : > { %v1781_v56 = vadd.f32 %v2362_v4, %v1765_v59  ;;  %v1528_v38 = vpack.c.bf16 %v1512_v11, %v1510_v57  ;;  %v1529_v43 = vpack.c.bf16 %v1513_v12, %v1511_v51  ;;  %v2381_v59 = vunpack.c.l.bf16 %v2389_v47 }
 0x421   : > { %1797 = vst [vmem:[%s2995_s5 + $0x28] sm:$0xff] %v1781_v56  ;;  %1669 = vmatmul.bf16.gmra.mxu2 %v1528_v38  ;;  %1718 = vmatmul.bf16.gmra.mxu3 %v1529_v43  ;;  %v2382_v43 = vunpack.c.h.bf16 %v2389_v47 }
 0x422   : > { %v1650_v48 = vpop.f32.mrf.mxu2  ;;  %v1699_v53 = vpop.f32.mrf.mxu3 }
 0x423   : > { %v1700_v5 = vadd.f32 %v1699_v53, %v1650_v48 }
 0x425   : > { %v1766_v17 = vmul.f32 %v3450_v58, %v1700_v5 }
 0x427   : > { %v1782_v7 = vadd.f32 %v2365_v6, %v1766_v17 }
 0x429   : > { %1798 = vst [vmem:[%s2995_s5 + $0x30] sm:$0xff] %v1782_v7 }
 0x42a   : > { %v1652_v14 = vpop.f32.mrf.mxu2  ;;  %v1701_v18 = vpop.f32.mrf.mxu3 }
 0x42b   : > { %v1702_v8 = vadd.f32 %v1701_v18, %v1652_v14 }
 0x42d   : > { %v1767_v20 = vmul.f32 %v3450_v58, %v1702_v8 }
 0x42f   : > { %v1783_v22 = vadd.f32 %v2366_v19, %v1767_v20 }
 0x431   : > { %1799 = vst [vmem:[%s2995_s5 + $0x38] sm:$0xff] %v1783_v22 }
 0x474   : > { %v1655_v54 = vpop.f32.mrf.mxu2  ;;  %v1704_v29 = vpop.f32.mrf.mxu3 }
 0x475   : > { %v1705_v28 = vadd.f32 %v1704_v29, %v1655_v54 }
 0x477   : > { %v1768_v0 = vmul.f32 %v3450_v58, %v1705_v28 }
 0x479   : > { %v1784_v13 = vadd.f32 %v2369_v32, %v1768_v0 }
 0x47b   : > { %1800 = vst [vmem:[%s2995_s5 + $0x40] sm:$0xff] %v1784_v13 }
 0x47c   : > { %v1657_v41 = vpop.f32.mrf.mxu2  ;;  %v1706_v40 = vpop.f32.mrf.mxu3 }
 0x47d   : > { %v1707_v45 = vadd.f32 %v1706_v40, %v1657_v41 }
 0x47f   : > { %v1769_v52 = vmul.f32 %v3450_v58, %v1707_v45 }
 0x481   : > { %v1785_v62 = vadd.f32 %v2370_v31, %v1769_v52 }
 0x483   : > { %1801 = vst [vmem:[%s2995_s5 + $0x48] sm:$0xff] %v1785_v62 }
 0x484   : > { %v1660_v37 = vpop.f32.mrf.mxu2  ;;  %v1709_v30 = vpop.f32.mrf.mxu3 }
 0x485   : > { %v1710_v63 = vadd.f32 %v1709_v30, %v1660_v37 }
 0x487   : > { %v1770_v10 = vmul.f32 %v3450_v58, %v1710_v63 }
 0x489   : > { %v1786_v39 = vadd.f32 %v2373_v9, %v1770_v10 }
 0x48b   : > { %1802 = vst [vmem:[%s2995_s5 + $0x50] sm:$0xff] %v1786_v39 }
 0x48c   : > { %v1662_v15 = vpop.f32.mrf.mxu2  ;;  %v1711_v1 = vpop.f32.mrf.mxu3 }
 0x48d   : > { %v1712_v26 = vadd.f32 %v1711_v1, %v1662_v15 }
 0x48f   : > { %v1771_v46 = vmul.f32 %v3450_v58, %v1712_v26 }
 0x491   : > { %v1787_v49 = vadd.f32 %v2374_v21, %v1771_v46 }
 0x493   : > { %1803 = vst [vmem:[%s2995_s5 + $0x58] sm:$0xff] %v1787_v49 }
 0x494   : > { %v1665_v2 = vpop.f32.mrf.mxu2  ;;  %v1714_v3 = vpop.f32.mrf.mxu3 }
 0x495   : > { %v1715_v23 = vadd.f32 %v1714_v3, %v1665_v2 }
 0x497   : > { %v1772_v60 = vmul.f32 %v3450_v58, %v1715_v23 }
 0x499   : > { %v1788_v25 = vadd.f32 %v2377_v16, %v1772_v60 }
 0x49b   : > { %1804 = vst [vmem:[%s2995_s5 + $0x60] sm:$0xff] %v1788_v25 }
 0x49c   : > { %v1667_v24 = vpop.f32.mrf.mxu2  ;;  %v1716_v27 = vpop.f32.mrf.mxu3 }
 0x49d   : > { %v1717_v42 = vadd.f32 %v1716_v27, %v1667_v24 }
 0x49f   : > { %v1773_v33 = vmul.f32 %v3450_v58, %v1717_v42 }
 0x4a1   : > { %v1789_v35 = vadd.f32 %v2378_v34, %v1773_v33 }
 0x4a3   : > { %1805 = vst [vmem:[%s2995_s5 + $0x68] sm:$0xff] %v1789_v35 }
 0x4a4   : > { %v1670_v4 = vpop.f32.mrf.mxu2  ;;  %v1719_v55 = vpop.f32.mrf.mxu3 }
 0x4a5   : > { %v1720_v57 = vadd.f32 %v1719_v55, %v1670_v4 }
 0x4a7   : > { %v1774_v11 = vmul.f32 %v3450_v58, %v1720_v57 }
 0x4a9   : > { %v1790_v51 = vadd.f32 %v2381_v59, %v1774_v11 }
 0x4ab   : > { %1806 = vst [vmem:[%s2995_s5 + $0x70] sm:$0xff] %v1790_v51 }
 0x4ac   : > { %v1672_v12 = vpop.f32.mrf.mxu2  ;;  %v1721_v56 = vpop.f32.mrf.mxu3 }
 0x4ad   : > { %v1722_v38 = vadd.f32 %v1721_v56, %v1672_v12 }
 0x4af   : > { %v1775_v44 = vmul.f32 %v3450_v58, %v1722_v38 }
 0x4b1   : > { %v1791_v48 = vadd.f32 %v2382_v43, %v1775_v44 }
 0x4b3   : > { %1807 = vst [vmem:[%s2995_s5 + $0x78] sm:$0xff] %v1791_v48 }
 0x4b4   : > { %2716 = shalt.err (!%p2713_p7)
}
 0x4b5   : > { %s2822_s4 = smov 128   ;;  %s2823_s5 = smov 8  }
 0x4b6   : > { %2420 = dma.vmem_to_hbm [thread:$0]  (%p2922_p6), %s1824_s3, 2048, %s1826_s29, %s1809_s30, %s2822_s4, %s2822_s4, %s2823_s5  }
 0x4b7 PF: > { %s3588_s13 = sld [smem:[#allocation13_spill]]  ;;  %p2437_p8 = scmp.ge.s32.totalorder %s2815_s26, 2 }
 0x4b9   : > { %p2431_p9 = pnand %p2437_p8, %p2928_p10 }
 0x4bb   : > { %p2432_p12 = pneg %p2431_p9 }
 0x4bd   : > { %s1840_s11 = sand.u32 1, %s3588_s13  }
 0x4be   : > { %s1841_s20 = scalar_lea.sflag [#allocation6], %s1840_s11 }
 0x4bf   : > { %2770 = dma.done.wait (%p2432_p12), %s1841_s20, 2048  }
 0x4c0   : > { %2772 = vsyncadd (%p2432_p12), %s1841_s20, 4294965248  ;;  %s22_s26 = sadd.s32 1, %s2815_s26   ;;  %s3590_s23 = sld [smem:[#allocation14_spill]] }
 0x4c1   : > { %p19_p13 = scmp.ge.s32.totalorder %s22_s26, 6   ;;  %s3591_s24 = sld [smem:[#allocation17_spill]] }
 0x4c2   : > { %s3592_s15 = sld [smem:[#allocation18_spill]]  ;;  %s3593_s17 = smov %s2779_s18 }
 0x4c3   : > { %s3594_s18 = smov %s2783_s19  ;;  %s3595_s19 = smov %s2970_s1 }
 0x4c4   : > { %s3596_s20 = smov %s2791_s21  ;;  %s3597_s21 = smov %s2795_s22 }
 0x4c5   : > { %s3598_s22 = smov %s2967_s14  ;;  %s3599_s3 = smov %s2811_s25 }
 0x4c6   :  { %21 = sbr.rel (!%p19_p13) target bundleno = 14 (0xe), region = 91 }
 0x4c8   : > { %s3600_s25 = smov %s3592_s15 }
 0x4cb   :  { %1847 = vsyncpa [#allocation5], 1 }
 0x4cc   :  { %1849 = vsyncpa [#allocation5 + $0x1], 1 }
 0x4cd   :  { %1850 = vsyncpa [#allocation8], 1 }
 0x4ce   :  { %1851 = vsyncpa [#allocation6], 1 }
 0x4cf   :  { %1853 = vsyncpa [#allocation6 + $0x1], 1 }

</bundles_post_ra>
